<compile_context>
chip_gen: v7x
topology: tpu7x:2x2x1
jax: 0.10.0
libtpu: 0.0.40
codegen_flags: <defaults>
</compile_context>

<pallas_src>
import math

import jax
import jax.numpy as jnp
import numpy as np
from jax.experimental import pallas as pl
from jax.experimental.pallas import tpu as pltpu

# Small, TPU-friendly shapes (hidden = 128 -> lane aligned).
B = 2            # batch
S = 8            # sequence length
BS = B * S       # flattened slab rows (time-major: row r = t*B + b)
H = 128          # hidden size
F = 256          # FFN intermediate size
VOCAB = 100
VOCAB_PAD = 128  # lane-aligned padded vocab for the one-hot MXU gather
NUM_CLASSES_A = 4
NUM_SENT = 3
LN_EPS = 1e-5
ATTN_SCALE = 1.0 / math.sqrt(H)


def layer_norm(h, gamma, beta):
    mu = jnp.mean(h, axis=-1, keepdims=True)
    var = jnp.mean((h - mu) ** 2, axis=-1, keepdims=True)
    return (h - mu) * jax.lax.rsqrt(var + LN_EPS) * gamma + beta


# ----------------------------------------------------------------------------
# Fused Pallas kernel: embedding -> encoder layer -> CLS -> both task heads
# ----------------------------------------------------------------------------
def fused_forward_kernel(ids_ref,        # (BS, 1)  i32, time-major token ids
                         bias_ref,       # (B, BS)  f32 additive attention bias
                         tok_emb_ref,    # (VOCAB_PAD, H) bf16
                         pos_emb_ref,    # (BS, H)  f32, pre-replicated
                         wqkv_ref, bqkv_ref, wo_ref, bo_ref,
                         g1_ref, be1_ref, w1_ref, b1_ref, w2_ref, b2_ref,
                         g2_ref, be2_ref,
                         wb1_ref, bb1_ref, whead_ref, bh_ref,
                         o_ref):         # (B, H) f32 packed logits slab

    def bdot(a, w_bf16):
        # bf16 x bf16 MXU matmul with f32 accumulation.
        return jnp.dot(a.astype(jnp.bfloat16), w_bf16,
                       preferred_element_type=jnp.float32)

    # ---- one-hot MXU embedding gather + positional add -> (BS, H) slab ----
    vocab_iota = jax.lax.broadcasted_iota(jnp.int32, (BS, VOCAB_PAD), 1)
    onehot = jnp.where(vocab_iota == ids_ref[...], 1.0, 0.0).astype(jnp.bfloat16)
    x = jnp.dot(onehot, tok_emb_ref[...], preferred_element_type=jnp.float32)
    x = x + pos_emb_ref[...]                                   # (BS, H) f32

    # ---- fused QKV projection (ATTN_SCALE folded into Q weights) ----
    qkv = bdot(x, wqkv_ref[...]) + bqkv_ref[...]               # (BS, 3H)
    k = qkv[:, H:2 * H]                                        # keys, all rows
    v = qkv[:, 2 * H:3 * H]                                    # values, all rows
    q_cls = qkv[:B, 0:H]                                       # CLS query rows only

    # ---- single masked attention matmul over all keys (CLS queries only) ----
    s = jax.lax.dot_general(q_cls, k, (((1,), (1,)), ((), ())),
                            preferred_element_type=jnp.float32)  # (B, BS)
    s = s + bias_ref[...]                                      # key mask + block-diag
    s = s - jnp.max(s, axis=-1, keepdims=True)                 # stable softmax
    p = jnp.exp(s)
    p = p * pl.reciprocal(jnp.sum(p, axis=-1, keepdims=True), approx=True)
    ctx = jnp.dot(p, v, preferred_element_type=jnp.float32)    # (B, H)

    attn = bdot(ctx, wo_ref[...]) + bo_ref[...]

    # ---- residual + LayerNorm 1 (CLS rows only) ----
    h = layer_norm(x[:B, :] + attn, g1_ref[...], be1_ref[...])

    # ---- FFN (CLS rows only) ----
    # TODO(synk): PyTorch nn.GELU defaults to exact erf; tanh approximation
    # (jax.nn.gelu default) is used here for a guaranteed Mosaic lowering.
    f = bdot(h, w1_ref[...]) + b1_ref[...]
    f = jax.nn.gelu(f)
    f = bdot(f, w2_ref[...]) + b2_ref[...]

    # ---- residual + LayerNorm 2 -> CLS vectors (B, H) ----
    h2 = layer_norm(h + f, g2_ref[...], be2_ref[...])

    # ---- task heads, one fused matmul into a lane-dense (B, 128) slab ----
    hb = jnp.maximum(bdot(h2, wb1_ref[...]) + bb1_ref[...], 0.0)   # head-B hidden
    heads_in = jnp.concatenate([h2, hb], axis=1)                   # (B, 2H)
    o_ref[...] = bdot(heads_in, whead_ref[...]) + bh_ref[...]


# ----------------------------------------------------------------------------
# Wrapper (jitted so mask/id reordering + output slicing fuse with the call)
# ----------------------------------------------------------------------------
@jax.jit
def multi_task_forward(input_ids, attention_mask, kp):
    """input_ids (B,S) i32, attention_mask (B,S) -> [logits_a (B,4), logits_b (B,3)]."""
    # Time-major flattening: slab row r = t*B + b  -> CLS rows are rows [0, B).
    ids_tm = input_ids.T.reshape(BS, 1).astype(jnp.int32)
    mask_tm = attention_mask.astype(jnp.float32).T.reshape(1, BS)

    # Additive attention bias for the B CLS queries over all BS keys:
    #   0 where key belongs to the same batch element AND is unmasked, else -1e9.
    key_batch = (jnp.arange(BS, dtype=jnp.int32) % B)[None, :]     # (1, BS)
    row_batch = jnp.arange(B, dtype=jnp.int32)[:, None]            # (B, 1)
    valid = (key_batch == row_batch) & (mask_tm > 0.5)
    attn_bias = jnp.where(valid, 0.0, -1e9).astype(jnp.float32)    # (B, BS)

    def full(shape):
        nd = len(shape)
        return pl.BlockSpec(shape, lambda i: (0,) * nd)

    in_specs = [
        full((BS, 1)),                        # token ids (time-major)
        full((B, BS)),                        # attention bias
        full((VOCAB_PAD, H)), full((BS, H)),  # token / positional embeddings
        full((H, 3 * H)), full((1, 3 * H)),   # packed QKV
        full((H, H)), full((1, H)),           # out proj
        full((1, H)), full((1, H)),           # LN1
        full((H, F)), full((1, F)),           # FFN 1
        full((F, H)), full((1, H)),           # FFN 2
        full((1, H)), full((1, H)),           # LN2
        full((H, H)), full((1, H)),           # head B hidden
        full((2 * H, H)), full((1, H)),       # stacked head outputs + packed bias
    ]
    slab = pl.pallas_call(
        fused_forward_kernel,
        out_shape=jax.ShapeDtypeStruct((B, H), jnp.float32),
        grid=(1,),
        in_specs=in_specs,
        out_specs=full((B, H)),
        compiler_params=pltpu.CompilerParams(
            dimension_semantics=("arbitrary",)),
    )(ids_tm, attn_bias,
      kp["tok_emb"], kp["pos_emb"],
      kp["wqkv"], kp["bqkv"], kp["wo"], kp["bo"],
      kp["g1"], kp["be1"], kp["w1"], kp["b1"], kp["w2"], kp["b2"],
      kp["g2"], kp["be2"],
      kp["wb1"], kp["bb1"], kp["whead"], kp["bh"])
    return [slab[:, :NUM_CLASSES_A],
            slab[:, NUM_CLASSES_A:NUM_CLASSES_A + NUM_SENT]]


# ----------------------------------------------------------------------------
# Pure-JAX reference (same bf16-at-MXU-inputs / bf16-embedding precision policy)
# ----------------------------------------------------------------------------
def reference_forward(input_ids, attention_mask, p):
    def bdot(a, w):
        return jnp.dot(a.astype(jnp.bfloat16), w.astype(jnp.bfloat16),
                       preferred_element_type=jnp.float32)
    tok = p["tok_emb"].astype(jnp.bfloat16).astype(jnp.float32)
    x = jnp.take(tok, input_ids, axis=0) + p["pos_emb"][None, :, :]
    m = attention_mask.astype(jnp.float32)[:, None, :]              # (B, 1, S)
    q = bdot(x, p["wq"]) + p["bq"]
    k = bdot(x, p["wk"]) + p["bk"]
    v = bdot(x, p["wv"]) + p["bv"]
    s = jnp.einsum("bqh,bkh->bqk", q, k) * ATTN_SCALE
    s = s + (m - 1.0) * 1e9
    s = s - jnp.max(s, axis=-1, keepdims=True)
    pr = jnp.exp(s)
    pr = pr / jnp.sum(pr, axis=-1, keepdims=True)
    attn = bdot(jnp.einsum("bqk,bkh->bqh", pr, v), p["wo"]) + p["bo"]
    h = layer_norm(x + attn, p["g1"], p["be1"])
    f = jax.nn.gelu(bdot(h, p["w1"]) + p["b1"])
    f = bdot(f, p["w2"]) + p["b2"]
    out = layer_norm(h + f, p["g2"], p["be2"])
    cls = out[:, 0, :]
    la = bdot(cls, p["wa"]) + p["ba"]
    hb = jnp.maximum(bdot(cls, p["wb1"]) + p["bb1"], 0.0)
    lb = bdot(hb, p["wb2"]) + p["bb2"]
    return [la, lb]


# ----------------------------------------------------------------------------
# Deterministic parameter init + kernel-side packing
# ----------------------------------------------------------------------------
def init_params(key):
    ks = jax.random.split(key, 16)
    n = lambda k, shape: (jax.random.normal(k, shape, jnp.float32) * 0.02)
    return {
        "tok_emb": n(ks[0], (VOCAB, H)),
        "pos_emb": n(ks[1], (S, H)),
        "wq": n(ks[2], (H, H)), "bq": jnp.zeros((1, H), jnp.float32),
        "wk": n(ks[3], (H, H)), "bk": jnp.zeros((1, H), jnp.float32),
        "wv": n(ks[4], (H, H)), "bv": jnp.zeros((1, H), jnp.float32),
        "wo": n(ks[5], (H, H)), "bo": jnp.zeros((1, H), jnp.float32),
        "g1": jnp.ones((1, H), jnp.float32), "be1": jnp.zeros((1, H), jnp.float32),
        "w1": n(ks[6], (H, F)), "b1": jnp.zeros((1, F), jnp.float32),
        "w2": n(ks[7], (F, H)), "b2": jnp.zeros((1, H), jnp.float32),
        "g2": jnp.ones((1, H), jnp.float32), "be2": jnp.zeros((1, H), jnp.float32),
        # Task A head: Linear(H, NUM_CLASSES_A)
        "wa": n(ks[8], (H, NUM_CLASSES_A)),
        "ba": jnp.zeros((1, NUM_CLASSES_A), jnp.float32),
        # Task B head: Linear(H, H) -> ReLU -> Linear(H, NUM_SENT)
        "wb1": n(ks[9], (H, H)), "bb1": jnp.zeros((1, H), jnp.float32),
        "wb2": n(ks[10], (H, NUM_SENT)),
        "bb2": jnp.zeros((1, NUM_SENT), jnp.float32),
    }


def pack_params(p):
    """Pack/scale/cast logical params into the layout the fused kernel expects."""
    b16 = lambda a: a.astype(jnp.bfloat16)
    # Fold attention scale into Q projection; fuse QKV along output columns.
    wqkv = jnp.concatenate([p["wq"] * ATTN_SCALE, p["wk"], p["wv"]], axis=1)
    bqkv = jnp.concatenate([p["bq"] * ATTN_SCALE, p["bk"], p["bv"]], axis=1)
    # Pad vocab to 128 rows (lane-aligned one-hot contraction) and cast bf16.
    tok_pad = jnp.zeros((VOCAB_PAD, H), jnp.float32).at[:VOCAB].set(p["tok_emb"])
    # Pre-replicate positional embeddings in time-major row order (row r = t*B+b).
    pos_rep = jnp.repeat(p["pos_emb"], B, axis=0)                    # (BS, H)
    # Stack both head output projections into one (2H, 128) lane-dense weight.
    wha = jnp.zeros((H, H), jnp.float32).at[:, :NUM_CLASSES_A].set(p["wa"])
    whb = jnp.zeros((H, H), jnp.float32).at[
        :, NUM_CLASSES_A:NUM_CLASSES_A + NUM_SENT].set(p["wb2"])
    whead = jnp.concatenate([wha, whb], axis=0)                      # (2H, H)
    bh = jnp.zeros((1, H), jnp.float32)
    bh = bh.at[:, :NUM_CLASSES_A].set(p["ba"])
    bh = bh.at[:, NUM_CLASSES_A:NUM_CLASSES_A + NUM_SENT].set(p["bb2"])
    return {
        "tok_emb": b16(tok_pad), "pos_emb": pos_rep,
        "wqkv": b16(wqkv), "bqkv": bqkv,
        "wo": b16(p["wo"]), "bo": p["bo"],
        "g1": p["g1"], "be1": p["be1"],
        "w1": b16(p["w1"]), "b1": p["b1"],
        "w2": b16(p["w2"]), "b2": p["b2"],
        "g2": p["g2"], "be2": p["be2"],
        "wb1": b16(p["wb1"]), "bb1": p["bb1"],
        "whead": b16(whead), "bh": bh,
    }


if __name__ == "__main__":
    key = jax.random.PRNGKey(0)
    pkey, ikey = jax.random.split(key)
    logical_params = init_params(pkey)
    kernel_params = pack_params(logical_params)

    # Synthetic "BatchEncoding": input_ids + attention_mask.
    # TODO(synk): tokenization / BatchEncoding device transfer has no Pallas
    # equivalent; inputs are pre-tokenized int32 ids.
    input_ids = jax.random.randint(ikey, (B, S), 0, VOCAB, dtype=jnp.int32)
    attention_mask = jnp.ones((B, S), jnp.float32).at[1, 6:].set(0.0)  # pad last 2 of ex 1

    outs = multi_task_forward(input_ids, attention_mask, kernel_params)
    outs = [jax.block_until_ready(o) for o in outs]

    refs = reference_forward(input_ids, attention_mask, logical_params)
    for o, r in zip(outs, refs):
        np.testing.assert_allclose(np.asarray(o), np.asarray(r), atol=2e-3, rtol=2e-3)

    print("KERNEL_OK")
</pallas_src>

<mosaic_0001>
module attributes {stable_mosaic.version = 11 : i64} {
  func.func @fused_forward_kernel(%arg0: i32, %arg1: memref<16x1xi32, #tpu.memory_space<vmem>>, %arg2: memref<2x16xf32, #tpu.memory_space<vmem>>, %arg3: memref<128x128xbf16, #tpu.memory_space<vmem>>, %arg4: memref<16x128xf32, #tpu.memory_space<vmem>>, %arg5: memref<128x384xbf16, #tpu.memory_space<vmem>>, %arg6: memref<1x384xf32, #tpu.memory_space<vmem>>, %arg7: memref<128x128xbf16, #tpu.memory_space<vmem>>, %arg8: memref<1x128xf32, #tpu.memory_space<vmem>>, %arg9: memref<1x128xf32, #tpu.memory_space<vmem>>, %arg10: memref<1x128xf32, #tpu.memory_space<vmem>>, %arg11: memref<128x256xbf16, #tpu.memory_space<vmem>>, %arg12: memref<1x256xf32, #tpu.memory_space<vmem>>, %arg13: memref<256x128xbf16, #tpu.memory_space<vmem>>, %arg14: memref<1x128xf32, #tpu.memory_space<vmem>>, %arg15: memref<1x128xf32, #tpu.memory_space<vmem>>, %arg16: memref<1x128xf32, #tpu.memory_space<vmem>>, %arg17: memref<128x128xbf16, #tpu.memory_space<vmem>>, %arg18: memref<1x128xf32, #tpu.memory_space<vmem>>, %arg19: memref<256x128xbf16, #tpu.memory_space<vmem>>, %arg20: memref<1x128xf32, #tpu.memory_space<vmem>>, %arg21: memref<2x128xf32, #tpu.memory_space<vmem>>) attributes {dimension_semantics = [#tpu.dimension_semantics<arbitrary>], iteration_bounds = array<i64: 1>, scalar_prefetch = 0 : i64, scratch_operands = 0 : i64, tpu.core_type = #tpu.core_type<tc>, window_params = [{pipeline_mode = #tpu.pipeline_mode<synchronous>, transform_indices = @transform_0, window_bounds = array<i64: 16, 1>}, {pipeline_mode = #tpu.pipeline_mode<synchronous>, transform_indices = @transform_1, window_bounds = array<i64: 2, 16>}, {pipeline_mode = #tpu.pipeline_mode<synchronous>, transform_indices = @transform_2, window_bounds = array<i64: 128, 128>}, {pipeline_mode = #tpu.pipeline_mode<synchronous>, transform_indices = @transform_3, window_bounds = array<i64: 16, 128>}, {pipeline_mode = #tpu.pipeline_mode<synchronous>, transform_indices = @transform_4, window_bounds = array<i64: 128, 384>}, {pipeline_mode = #tpu.pipeline_mode<synchronous>, transform_indices = @transform_5, window_bounds = array<i64: 1, 384>}, {pipeline_mode = #tpu.pipeline_mode<synchronous>, transform_indices = @transform_6, window_bounds = array<i64: 128, 128>}, {pipeline_mode = #tpu.pipeline_mode<synchronous>, transform_indices = @transform_7, window_bounds = array<i64: 1, 128>}, {pipeline_mode = #tpu.pipeline_mode<synchronous>, transform_indices = @transform_8, window_bounds = array<i64: 1, 128>}, {pipeline_mode = #tpu.pipeline_mode<synchronous>, transform_indices = @transform_9, window_bounds = array<i64: 1, 128>}, {pipeline_mode = #tpu.pipeline_mode<synchronous>, transform_indices = @transform_10, window_bounds = array<i64: 128, 256>}, {pipeline_mode = #tpu.pipeline_mode<synchronous>, transform_indices = @transform_11, window_bounds = array<i64: 1, 256>}, {pipeline_mode = #tpu.pipeline_mode<synchronous>, transform_indices = @transform_12, window_bounds = array<i64: 256, 128>}, {pipeline_mode = #tpu.pipeline_mode<synchronous>, transform_indices = @transform_13, window_bounds = array<i64: 1, 128>}, {pipeline_mode = #tpu.pipeline_mode<synchronous>, transform_indices = @transform_14, window_bounds = array<i64: 1, 128>}, {pipeline_mode = #tpu.pipeline_mode<synchronous>, transform_indices = @transform_15, window_bounds = array<i64: 1, 128>}, {pipeline_mode = #tpu.pipeline_mode<synchronous>, transform_indices = @transform_16, window_bounds = array<i64: 128, 128>}, {pipeline_mode = #tpu.pipeline_mode<synchronous>, transform_indices = @transform_17, window_bounds = array<i64: 1, 128>}, {pipeline_mode = #tpu.pipeline_mode<synchronous>, transform_indices = @transform_18, window_bounds = array<i64: 256, 128>}, {pipeline_mode = #tpu.pipeline_mode<synchronous>, transform_indices = @transform_19, window_bounds = array<i64: 1, 128>}, {pipeline_mode = #tpu.pipeline_mode<synchronous>, transform_indices = @transform_20, window_bounds = array<i64: 2, 128>}]} {
    %0 = tpu.iota {dimensions = array<i32: 1>} : vector<16x128xi32>
    %c0 = arith.constant 0 : index
    %c0_0 = arith.constant 0 : index
    %1 = vector.load %arg1[%c0, %c0_0] : memref<16x1xi32, #tpu.memory_space<vmem>>, vector<16x1xi32>
    %2 = vector.broadcast %1 : vector<16x1xi32> to vector<16x128xi32>
    %3 = arith.cmpi eq, %0, %2 : vector<16x128xi32>
    %cst = arith.constant 1.000000e+00 : f32
    %cst_1 = arith.constant 0.000000e+00 : f32
    %4 = vector.broadcast %cst : f32 to vector<16x128xf32>
    %5 = vector.broadcast %cst_1 : f32 to vector<16x128xf32>
    %6 = arith.select %3, %4, %5 : vector<16x128xi1>, vector<16x128xf32>
    %7 = arith.truncf %6 : vector<16x128xf32> to vector<16x128xbf16>
    %c0_2 = arith.constant 0 : index
    %c0_3 = arith.constant 0 : index
    %8 = vector.load %arg3[%c0_2, %c0_3] : memref<128x128xbf16, #tpu.memory_space<vmem>>, vector<128x128xbf16>
    %cst_4 = arith.constant dense<0.000000e+00> : vector<16x128xf32>
    %9 = tpu.matmul %7, %8, %cst_4 {dimension_numbers = #tpu.dot_dimension_numbers<[1], [0], [0], [1], [0, 0, 1, 1], [], []>} : vector<16x128xbf16>, vector<128x128xbf16>, vector<16x128xf32> -> vector<16x128xf32>
    %c0_5 = arith.constant 0 : index
    %c0_6 = arith.constant 0 : index
    %10 = vector.load %arg4[%c0_5, %c0_6] : memref<16x128xf32, #tpu.memory_space<vmem>>, vector<16x128xf32>
    %11 = arith.addf %9, %10 : vector<16x128xf32>
    %c0_7 = arith.constant 0 : index
    %c0_8 = arith.constant 0 : index
    %12 = vector.load %arg5[%c0_7, %c0_8] : memref<128x384xbf16, #tpu.memory_space<vmem>>, vector<128x384xbf16>
    %13 = arith.truncf %11 : vector<16x128xf32> to vector<16x128xbf16>
    %cst_9 = arith.constant dense<0.000000e+00> : vector<16x384xf32>
    %14 = tpu.matmul %13, %12, %cst_9 {dimension_numbers = #tpu.dot_dimension_numbers<[1], [0], [0], [1], [0, 0, 1, 1], [], []>} : vector<16x128xbf16>, vector<128x384xbf16>, vector<16x384xf32> -> vector<16x384xf32>
    %c0_10 = arith.constant 0 : index
    %c0_11 = arith.constant 0 : index
    %15 = vector.load %arg6[%c0_10, %c0_11] : memref<1x384xf32, #tpu.memory_space<vmem>>, vector<1x384xf32>
    %16 = vector.broadcast %15 : vector<1x384xf32> to vector<16x384xf32>
    %17 = arith.addf %14, %16 : vector<16x384xf32>
    %18 = vector.extract_strided_slice %17 {offsets = [0, 128], sizes = [16, 128], strides = [1, 1]} : vector<16x384xf32> to vector<16x128xf32>
    %19 = vector.extract_strided_slice %17 {offsets = [0, 256], sizes = [16, 128], strides = [1, 1]} : vector<16x384xf32> to vector<16x128xf32>
    %20 = vector.extract_strided_slice %17 {offsets = [0, 0], sizes = [2, 128], strides = [1, 1]} : vector<16x384xf32> to vector<2x128xf32>
    %cst_12 = arith.constant dense<0.000000e+00> : vector<2x16xf32>
    %21 = tpu.matmul %20, %18, %cst_12 {dimension_numbers = #tpu.dot_dimension_numbers<[1], [1], [0], [0], [0, 0, 1, 0], [], []>} : vector<2x128xf32>, vector<16x128xf32>, vector<2x16xf32> -> vector<2x16xf32>
    %c0_13 = arith.constant 0 : index
    %c0_14 = arith.constant 0 : index
    %22 = vector.load %arg2[%c0_13, %c0_14] : memref<2x16xf32, #tpu.memory_space<vmem>>, vector<2x16xf32>
    %23 = arith.addf %21, %22 : vector<2x16xf32>
    %cst_15 = arith.constant dense<0xFF800000> : vector<2xf32>
    %24 = vector.multi_reduction <maximumf>, %23, %cst_15 [1] : vector<2x16xf32> to vector<2xf32>
    %25 = vector.shape_cast %24 : vector<2xf32> to vector<2x1xf32>
    %26 = vector.broadcast %25 : vector<2x1xf32> to vector<2x16xf32>
    %27 = arith.subf %23, %26 : vector<2x16xf32>
    %28 = math.exp %27 : vector<2x16xf32>
    %cst_16 = arith.constant dense<0.000000e+00> : vector<2xf32>
    %29 = vector.multi_reduction <add>, %28, %cst_16 [1] : vector<2x16xf32> to vector<2xf32>
    %30 = vector.shape_cast %29 : vector<2xf32> to vector<2x1xf32>
    %31 = tpu.reciprocal %30 {approx = true} : vector<2x1xf32> -> vector<2x1xf32>
    %32 = vector.broadcast %31 : vector<2x1xf32> to vector<2x16xf32>
    %33 = arith.mulf %28, %32 : vector<2x16xf32>
    %cst_17 = arith.constant dense<0.000000e+00> : vector<2x128xf32>
    %34 = tpu.matmul %33, %19, %cst_17 {dimension_numbers = #tpu.dot_dimension_numbers<[1], [0], [0], [1], [0, 0, 1, 1], [], []>} : vector<2x16xf32>, vector<16x128xf32>, vector<2x128xf32> -> vector<2x128xf32>
    %c0_18 = arith.constant 0 : index
    %c0_19 = arith.constant 0 : index
    %35 = vector.load %arg7[%c0_18, %c0_19] : memref<128x128xbf16, #tpu.memory_space<vmem>>, vector<128x128xbf16>
    %36 = arith.truncf %34 : vector<2x128xf32> to vector<2x128xbf16>
    %cst_20 = arith.constant dense<0.000000e+00> : vector<2x128xf32>
    %37 = tpu.matmul %36, %35, %cst_20 {dimension_numbers = #tpu.dot_dimension_numbers<[1], [0], [0], [1], [0, 0, 1, 1], [], []>} : vector<2x128xbf16>, vector<128x128xbf16>, vector<2x128xf32> -> vector<2x128xf32>
    %c0_21 = arith.constant 0 : index
    %c0_22 = arith.constant 0 : index
    %38 = vector.load %arg8[%c0_21, %c0_22] : memref<1x128xf32, #tpu.memory_space<vmem>>, vector<1x128xf32>
    %39 = vector.broadcast %38 : vector<1x128xf32> to vector<2x128xf32>
    %40 = arith.addf %37, %39 : vector<2x128xf32>
    %41 = vector.extract_strided_slice %11 {offsets = [0, 0], sizes = [2, 128], strides = [1, 1]} : vector<16x128xf32> to vector<2x128xf32>
    %42 = arith.addf %41, %40 : vector<2x128xf32>
    %c0_23 = arith.constant 0 : index
    %c0_24 = arith.constant 0 : index
    %43 = vector.load %arg9[%c0_23, %c0_24] : memref<1x128xf32, #tpu.memory_space<vmem>>, vector<1x128xf32>
    %c0_25 = arith.constant 0 : index
    %c0_26 = arith.constant 0 : index
    %44 = vector.load %arg10[%c0_25, %c0_26] : memref<1x128xf32, #tpu.memory_space<vmem>>, vector<1x128xf32>
    %cst_27 = arith.constant dense<0.000000e+00> : vector<2xf32>
    %45 = vector.multi_reduction <add>, %42, %cst_27 [1] : vector<2x128xf32> to vector<2xf32>
    %46 = vector.shape_cast %45 : vector<2xf32> to vector<2x1xf32>
    %cst_28 = arith.constant 1.280000e+02 : f32
    %47 = vector.broadcast %cst_28 : f32 to vector<2x1xf32>
    %48 = arith.divf %46, %47 : vector<2x1xf32>
    %49 = vector.broadcast %48 : vector<2x1xf32> to vector<2x128xf32>
    %50 = arith.subf %42, %49 : vector<2x128xf32>
    %51 = arith.mulf %50, %50 : vector<2x128xf32>
    %cst_29 = arith.constant dense<0.000000e+00> : vector<2xf32>
    %52 = vector.multi_reduction <add>, %51, %cst_29 [1] : vector<2x128xf32> to vector<2xf32>
    %53 = vector.shape_cast %52 : vector<2xf32> to vector<2x1xf32>
    %cst_30 = arith.constant 1.280000e+02 : f32
    %54 = vector.broadcast %cst_30 : f32 to vector<2x1xf32>
    %55 = arith.divf %53, %54 : vector<2x1xf32>
    %56 = vector.broadcast %48 : vector<2x1xf32> to vector<2x128xf32>
    %57 = arith.subf %42, %56 : vector<2x128xf32>
    %cst_31 = arith.constant 9.99999974E-6 : f32
    %58 = vector.broadcast %cst_31 : f32 to vector<2x1xf32>
    %59 = arith.addf %55, %58 : vector<2x1xf32>
    %60 = math.rsqrt %59 : vector<2x1xf32>
    %61 = vector.broadcast %60 : vector<2x1xf32> to vector<2x128xf32>
    %62 = arith.mulf %57, %61 : vector<2x128xf32>
    %63 = vector.broadcast %43 : vector<1x128xf32> to vector<2x128xf32>
    %64 = arith.mulf %62, %63 : vector<2x128xf32>
    %65 = vector.broadcast %44 : vector<1x128xf32> to vector<2x128xf32>
    %66 = arith.addf %64, %65 : vector<2x128xf32>
    %c0_32 = arith.constant 0 : index
    %c0_33 = arith.constant 0 : index
    %67 = vector.load %arg11[%c0_32, %c0_33] : memref<128x256xbf16, #tpu.memory_space<vmem>>, vector<128x256xbf16>
    %68 = arith.truncf %66 : vector<2x128xf32> to vector<2x128xbf16>
    %cst_34 = arith.constant dense<0.000000e+00> : vector<2x256xf32>
    %69 = tpu.matmul %68, %67, %cst_34 {dimension_numbers = #tpu.dot_dimension_numbers<[1], [0], [0], [1], [0, 0, 1, 1], [], []>} : vector<2x128xbf16>, vector<128x256xbf16>, vector<2x256xf32> -> vector<2x256xf32>
    %c0_35 = arith.constant 0 : index
    %c0_36 = arith.constant 0 : index
    %70 = vector.load %arg12[%c0_35, %c0_36] : memref<1x256xf32, #tpu.memory_space<vmem>>, vector<1x256xf32>
    %71 = vector.broadcast %70 : vector<1x256xf32> to vector<2x256xf32>
    %72 = arith.addf %69, %71 : vector<2x256xf32>
    %73 = arith.mulf %72, %72 : vector<2x256xf32>
    %74 = arith.mulf %72, %73 : vector<2x256xf32>
    %cst_37 = arith.constant 4.471500e-02 : f32
    %75 = vector.broadcast %cst_37 : f32 to vector<2x256xf32>
    %76 = arith.mulf %75, %74 : vector<2x256xf32>
    %77 = arith.addf %72, %76 : vector<2x256xf32>
    %cst_38 = arith.constant 0.797884583 : f32
    %78 = vector.broadcast %cst_38 : f32 to vector<2x256xf32>
    %79 = arith.mulf %78, %77 : vector<2x256xf32>
    %80 = math.tanh %79 : vector<2x256xf32>
    %cst_39 = arith.constant 1.000000e+00 : f32
    %81 = vector.broadcast %cst_39 : f32 to vector<2x256xf32>
    %82 = arith.addf %81, %80 : vector<2x256xf32>
    %cst_40 = arith.constant 5.000000e-01 : f32
    %83 = vector.broadcast %cst_40 : f32 to vector<2x256xf32>
    %84 = arith.mulf %83, %82 : vector<2x256xf32>
    %85 = arith.mulf %72, %84 : vector<2x256xf32>
    %c0_41 = arith.constant 0 : index
    %c0_42 = arith.constant 0 : index
    %86 = vector.load %arg13[%c0_41, %c0_42] : memref<256x128xbf16, #tpu.memory_space<vmem>>, vector<256x128xbf16>
    %87 = arith.truncf %85 : vector<2x256xf32> to vector<2x256xbf16>
    %cst_43 = arith.constant dense<0.000000e+00> : vector<2x128xf32>
    %88 = tpu.matmul %87, %86, %cst_43 {dimension_numbers = #tpu.dot_dimension_numbers<[1], [0], [0], [1], [0, 0, 1, 1], [], []>} : vector<2x256xbf16>, vector<256x128xbf16>, vector<2x128xf32> -> vector<2x128xf32>
    %c0_44 = arith.constant 0 : index
    %c0_45 = arith.constant 0 : index
    %89 = vector.load %arg14[%c0_44, %c0_45] : memref<1x128xf32, #tpu.memory_space<vmem>>, vector<1x128xf32>
    %90 = vector.broadcast %89 : vector<1x128xf32> to vector<2x128xf32>
    %91 = arith.addf %88, %90 : vector<2x128xf32>
    %92 = arith.addf %66, %91 : vector<2x128xf32>
    %c0_46 = arith.constant 0 : index
    %c0_47 = arith.constant 0 : index
    %93 = vector.load %arg15[%c0_46, %c0_47] : memref<1x128xf32, #tpu.memory_space<vmem>>, vector<1x128xf32>
    %c0_48 = arith.constant 0 : index
    %c0_49 = arith.constant 0 : index
    %94 = vector.load %arg16[%c0_48, %c0_49] : memref<1x128xf32, #tpu.memory_space<vmem>>, vector<1x128xf32>
    %cst_50 = arith.constant dense<0.000000e+00> : vector<2xf32>
    %95 = vector.multi_reduction <add>, %92, %cst_50 [1] : vector<2x128xf32> to vector<2xf32>
    %96 = vector.shape_cast %95 : vector<2xf32> to vector<2x1xf32>
    %cst_51 = arith.constant 1.280000e+02 : f32
    %97 = vector.broadcast %cst_51 : f32 to vector<2x1xf32>
    %98 = arith.divf %96, %97 : vector<2x1xf32>
    %99 = vector.broadcast %98 : vector<2x1xf32> to vector<2x128xf32>
    %100 = arith.subf %92, %99 : vector<2x128xf32>
    %101 = arith.mulf %100, %100 : vector<2x128xf32>
    %cst_52 = arith.constant dense<0.000000e+00> : vector<2xf32>
    %102 = vector.multi_reduction <add>, %101, %cst_52 [1] : vector<2x128xf32> to vector<2xf32>
    %103 = vector.shape_cast %102 : vector<2xf32> to vector<2x1xf32>
    %cst_53 = arith.constant 1.280000e+02 : f32
    %104 = vector.broadcast %cst_53 : f32 to vector<2x1xf32>
    %105 = arith.divf %103, %104 : vector<2x1xf32>
    %106 = vector.broadcast %98 : vector<2x1xf32> to vector<2x128xf32>
    %107 = arith.subf %92, %106 : vector<2x128xf32>
    %cst_54 = arith.constant 9.99999974E-6 : f32
    %108 = vector.broadcast %cst_54 : f32 to vector<2x1xf32>
    %109 = arith.addf %105, %108 : vector<2x1xf32>
    %110 = math.rsqrt %109 : vector<2x1xf32>
    %111 = vector.broadcast %110 : vector<2x1xf32> to vector<2x128xf32>
    %112 = arith.mulf %107, %111 : vector<2x128xf32>
    %113 = vector.broadcast %93 : vector<1x128xf32> to vector<2x128xf32>
    %114 = arith.mulf %112, %113 : vector<2x128xf32>
    %115 = vector.broadcast %94 : vector<1x128xf32> to vector<2x128xf32>
    %116 = arith.addf %114, %115 : vector<2x128xf32>
    %c0_55 = arith.constant 0 : index
    %c0_56 = arith.constant 0 : index
    %117 = vector.load %arg17[%c0_55, %c0_56] : memref<128x128xbf16, #tpu.memory_space<vmem>>, vector<128x128xbf16>
    %118 = arith.truncf %116 : vector<2x128xf32> to vector<2x128xbf16>
    %cst_57 = arith.constant dense<0.000000e+00> : vector<2x128xf32>
    %119 = tpu.matmul %118, %117, %cst_57 {dimension_numbers = #tpu.dot_dimension_numbers<[1], [0], [0], [1], [0, 0, 1, 1], [], []>} : vector<2x128xbf16>, vector<128x128xbf16>, vector<2x128xf32> -> vector<2x128xf32>
    %c0_58 = arith.constant 0 : index
    %c0_59 = arith.constant 0 : index
    %120 = vector.load %arg18[%c0_58, %c0_59] : memref<1x128xf32, #tpu.memory_space<vmem>>, vector<1x128xf32>
    %121 = vector.broadcast %120 : vector<1x128xf32> to vector<2x128xf32>
    %122 = arith.addf %119, %121 : vector<2x128xf32>
    %cst_60 = arith.constant 0.000000e+00 : f32
    %123 = vector.broadcast %cst_60 : f32 to vector<2x128xf32>
    %124 = arith.maximumf %122, %123 : vector<2x128xf32>
    %125 = tpu.concatenate %116, %124 in 1 : vector<2x128xf32>, vector<2x128xf32> -> vector<2x256xf32>
    %c0_61 = arith.constant 0 : index
    %c0_62 = arith.constant 0 : index
    %126 = vector.load %arg19[%c0_61, %c0_62] : memref<256x128xbf16, #tpu.memory_space<vmem>>, vector<256x128xbf16>
    %127 = arith.truncf %125 : vector<2x256xf32> to vector<2x256xbf16>
    %cst_63 = arith.constant dense<0.000000e+00> : vector<2x128xf32>
    %128 = tpu.matmul %127, %126, %cst_63 {dimension_numbers = #tpu.dot_dimension_numbers<[1], [0], [0], [1], [0, 0, 1, 1], [], []>} : vector<2x256xbf16>, vector<256x128xbf16>, vector<2x128xf32> -> vector<2x128xf32>
    %c0_64 = arith.constant 0 : index
    %c0_65 = arith.constant 0 : index
    %129 = vector.load %arg20[%c0_64, %c0_65] : memref<1x128xf32, #tpu.memory_space<vmem>>, vector<1x128xf32>
    %130 = vector.broadcast %129 : vector<1x128xf32> to vector<2x128xf32>
    %131 = arith.addf %128, %130 : vector<2x128xf32>
    %c0_66 = arith.constant 0 : index
    %c0_67 = arith.constant 0 : index
    %132 = vector.load %arg21[%c0_66, %c0_67] : memref<2x128xf32, #tpu.memory_space<vmem>>, vector<2x128xf32>
    tpu.vector_store %arg21[%c0_66, %c0_67], %131 {strides = array<i32>} : memref<2x128xf32, #tpu.memory_space<vmem>>, vector<2x128xf32>,
    return
  }
  func.func @transform_0(%arg0: i32) -> (i32, i32) {
    %c0_i32 = arith.constant 0 : i32
    %c0_i32_0 = arith.constant 0 : i32
    %c0_i32_1 = arith.constant 0 : i32
    return %c0_i32, %c0_i32_0 : i32, i32
  }
  func.func @transform_1(%arg0: i32) -> (i32, i32) {
    %c0_i32 = arith.constant 0 : i32
    %c0_i32_0 = arith.constant 0 : i32
    %c0_i32_1 = arith.constant 0 : i32
    return %c0_i32, %c0_i32_0 : i32, i32
  }
  func.func @transform_2(%arg0: i32) -> (i32, i32) {
    %c0_i32 = arith.constant 0 : i32
    %c0_i32_0 = arith.constant 0 : i32
    %c0_i32_1 = arith.constant 0 : i32
    return %c0_i32, %c0_i32_0 : i32, i32
  }
  func.func @transform_3(%arg0: i32) -> (i32, i32) {
    %c0_i32 = arith.constant 0 : i32
    %c0_i32_0 = arith.constant 0 : i32
    %c0_i32_1 = arith.constant 0 : i32
    return %c0_i32, %c0_i32_0 : i32, i32
  }
  func.func @transform_4(%arg0: i32) -> (i32, i32) {
    %c0_i32 = arith.constant 0 : i32
    %c0_i32_0 = arith.constant 0 : i32
    %c0_i32_1 = arith.constant 0 : i32
    return %c0_i32, %c0_i32_0 : i32, i32
  }
  func.func @transform_5(%arg0: i32) -> (i32, i32) {
    %c0_i32 = arith.constant 0 : i32
    %c0_i32_0 = arith.constant 0 : i32
    %c0_i32_1 = arith.constant 0 : i32
    return %c0_i32, %c0_i32_0 : i32, i32
  }
  func.func @transform_6(%arg0: i32) -> (i32, i32) {
    %c0_i32 = arith.constant 0 : i32
    %c0_i32_0 = arith.constant 0 : i32
    %c0_i32_1 = arith.constant 0 : i32
    return %c0_i32, %c0_i32_0 : i32, i32
  }
  func.func @transform_7(%arg0: i32) -> (i32, i32) {
    %c0_i32 = arith.constant 0 : i32
    %c0_i32_0 = arith.constant 0 : i32
    %c0_i32_1 = arith.constant 0 : i32
    return %c0_i32, %c0_i32_0 : i32, i32
  }
  func.func @transform_8(%arg0: i32) -> (i32, i32) {
    %c0_i32 = arith.constant 0 : i32
    %c0_i32_0 = arith.constant 0 : i32
    %c0_i32_1 = arith.constant 0 : i32
    return %c0_i32, %c0_i32_0 : i32, i32
  }
  func.func @transform_9(%arg0: i32) -> (i32, i32) {
    %c0_i32 = arith.constant 0 : i32
    %c0_i32_0 = arith.constant 0 : i32
    %c0_i32_1 = arith.constant 0 : i32
    return %c0_i32, %c0_i32_0 : i32, i32
  }
  func.func @transform_10(%arg0: i32) -> (i32, i32) {
    %c0_i32 = arith.constant 0 : i32
    %c0_i32_0 = arith.constant 0 : i32
    %c0_i32_1 = arith.constant 0 : i32
    return %c0_i32, %c0_i32_0 : i32, i32
  }
  func.func @transform_11(%arg0: i32) -> (i32, i32) {
    %c0_i32 = arith.constant 0 : i32
    %c0_i32_0 = arith.constant 0 : i32
    %c0_i32_1 = arith.constant 0 : i32
    return %c0_i32, %c0_i32_0 : i32, i32
  }
  func.func @transform_12(%arg0: i32) -> (i32, i32) {
    %c0_i32 = arith.constant 0 : i32
    %c0_i32_0 = arith.constant 0 : i32
    %c0_i32_1 = arith.constant 0 : i32
    return %c0_i32, %c0_i32_0 : i32, i32
  }
  func.func @transform_13(%arg0: i32) -> (i32, i32) {
    %c0_i32 = arith.constant 0 : i32
    %c0_i32_0 = arith.constant 0 : i32
    %c0_i32_1 = arith.constant 0 : i32
    return %c0_i32, %c0_i32_0 : i32, i32
  }
  func.func @transform_14(%arg0: i32) -> (i32, i32) {
    %c0_i32 = arith.constant 0 : i32
    %c0_i32_0 = arith.constant 0 : i32
    %c0_i32_1 = arith.constant 0 : i32
    return %c0_i32, %c0_i32_0 : i32, i32
  }
  func.func @transform_15(%arg0: i32) -> (i32, i32) {
    %c0_i32 = arith.constant 0 : i32
    %c0_i32_0 = arith.constant 0 : i32
    %c0_i32_1 = arith.constant 0 : i32
    return %c0_i32, %c0_i32_0 : i32, i32
  }
  func.func @transform_16(%arg0: i32) -> (i32, i32) {
    %c0_i32 = arith.constant 0 : i32
    %c0_i32_0 = arith.constant 0 : i32
    %c0_i32_1 = arith.constant 0 : i32
    return %c0_i32, %c0_i32_0 : i32, i32
  }
  func.func @transform_17(%arg0: i32) -> (i32, i32) {
    %c0_i32 = arith.constant 0 : i32
    %c0_i32_0 = arith.constant 0 : i32
    %c0_i32_1 = arith.constant 0 : i32
    return %c0_i32, %c0_i32_0 : i32, i32
  }
  func.func @transform_18(%arg0: i32) -> (i32, i32) {
    %c0_i32 = arith.constant 0 : i32
    %c0_i32_0 = arith.constant 0 : i32
    %c0_i32_1 = arith.constant 0 : i32
    return %c0_i32, %c0_i32_0 : i32, i32
  }
  func.func @transform_19(%arg0: i32) -> (i32, i32) {
    %c0_i32 = arith.constant 0 : i32
    %c0_i32_0 = arith.constant 0 : i32
    %c0_i32_1 = arith.constant 0 : i32
    return %c0_i32, %c0_i32_0 : i32, i32
  }
  func.func @transform_20(%arg0: i32) -> (i32, i32) {
    %c0_i32 = arith.constant 0 : i32
    %c0_i32_0 = arith.constant 0 : i32
    %c0_i32_1 = arith.constant 0 : i32
    return %c0_i32, %c0_i32_0 : i32, i32
  }
}

</mosaic_0001>

<bundles_post_ra>
// kernel: multi_task_forward.1
= control target key start
LH: loop header
LB: loop body
LE: loop exit
PB: predicated region body
PF: predicated region fallthrough
CT: control target
= control target key end

     0   :  { %s2475_s0 = inlined_call_operand.vmem [shape: s32[16,1], index: 0, kind: input, shape index: {}]   ;;  %s2476_s1 = inlined_call_operand.vmem [shape: f32[2,16], index: 1, kind: input, shape index: {}]   ;;  %s2477_s2 = inlined_call_operand.vmem [shape: bf16[128,128], index: 2, kind: input, shape index: {}]   ;;  %s2478_s3 = inlined_call_operand.vmem [shape: f32[16,128], index: 3, kind: input, shape index: {}]   ;;  %s2479_s4 = inlined_call_operand.hbm [shape: bf16[128,384], index: 4, kind: input, shape index: {}]   ;;  %s2480_s5 = inlined_call_operand.vmem [shape: f32[1,384], index: 5, kind: input, shape index: {}]   ;;  %s2481_s6 = inlined_call_operand.hbm [shape: bf16[128,128], index: 6, kind: input, shape index: {}]   ;;  %s2482_s7 = inlined_call_operand.vmem [shape: f32[1,128], index: 7, kind: input, shape index: {}]   ;;  %s2483_s8 = inlined_call_operand.vmem [shape: f32[1,128], index: 8, kind: input, shape index: {}]   ;;  %s2484_s9 = inlined_call_operand.vmem [shape: f32[1,128], index: 9, kind: input, shape index: {}]   ;;  %s2485_s10 = inlined_call_operand.hbm [shape: bf16[128,256], index: 10, kind: input, shape index: {}]   ;;  %s2486_s11 = inlined_call_operand.vmem [shape: f32[1,256], index: 11, kind: input, shape index: {}]   ;;  %s2487_s12 = inlined_call_operand.hbm [shape: bf16[256,128], index: 12, kind: input, shape index: {}]   ;;  %s2488_s13 = inlined_call_operand.vmem [shape: f32[1,128], index: 13, kind: input, shape index: {}]   ;;  %s2489_s14 = inlined_call_operand.hbm [shape: f32[1,128], index: 14, kind: input, shape index: {}]   ;;  %s2490_s15 = inlined_call_operand.vmem [shape: f32[1,128], index: 15, kind: input, shape index: {}]   ;;  %s2491_s16 = inlined_call_operand.hbm [shape: bf16[128,128], index: 16, kind: input, shape index: {}]   ;;  %s2492_s17 = inlined_call_operand.vmem [shape: f32[1,128], index: 17, kind: input, shape index: {}]   ;;  %s2493_s18 = inlined_call_operand.hbm [shape: bf16[256,128], index: 18, kind: input, shape index: {}]   ;;  %s2494_s19 = inlined_call_operand.vmem [shape: f32[1,128], index: 19, kind: input, shape index: {}]   ;;  %s2495_s20 = inlined_call_operand.vmem [shape: f32[2,128], index: 20, kind: output, shape index: {}]  }
   0x1   :  { %2500 = sst [smem:[#allocation17_spill]] %s2475_s0 }
   0x2   :  { %2501 = sst [smem:[#allocation18_spill]] %s2476_s1 }
   0x3   :  { %2502 = sst [smem:[#allocation19_spill]] %s2477_s2 }
   0x4   :  { %2503 = sst [smem:[#allocation20_spill]] %s2478_s3 }
   0x5   :  { %2504 = sst [smem:[#allocation21_spill]] %s2479_s4 }
   0x6   :  { %2505 = sst [smem:[#allocation22_spill]] %s2495_s20 }
   0x7   :  { %25 = vsyncpa [#allocation3], 0 }
   0x8   :  { %26 = vsyncpa [#allocation5], 0 }
   0x9   :  { %27 = vsyncpa [#allocation8], 0 }
   0xa   :  { %28 = vsyncpa [#allocation11], 0  ;;  %s2114_s1 = smov [#allocation4]   ;;  %s1952_s2 = scalar_lea.hbm %s2481_s6, 1024 }
   0xb   :  { %s56_s22 = sshll.u32 %s2114_s1, 4  ;;  %p1953_p0 = scmp.ne.s32.totalorder %s2481_s6, %s1952_s2  ;;  %s57_s22 = int_to_ptr.vmem [resolvable:$true] %s56_s22 }
   0xc   :  { %p1956_p1 = scmp.lt.u32.totalorder %s1952_s2, %s2481_s6 }
   0xe   :  { %p1958_p2 = pnand %p1956_p1, %p1953_p0 }
  0x10   :  { %1961 = shalt.err (!%p1958_p2)
}
  0x11   :  { %s1962_s28 = scalar_lea.vmem %s57_s22, 1024  ;;  %p1967_p4 = scmp.lt.s32.totalorder %s57_s22, %s57_s22 }
  0x12   :  { %p1963_p3 = scmp.ne.s32.totalorder %s57_s22, %s1962_s28  ;;  %p1968_p5 = scmp.lt.s32.totalorder %s1962_s28, %s1962_s28 }
  0x14   :  { %p1969_p6 = por %p1968_p5, %p1967_p4 }
  0x16   :  { %p1970_p7 = pnand %p1969_p6, %p1963_p3 }
  0x18   :  { %1973 = shalt.err (!%p1970_p7)
}
  0x19   :  { %s2115_s4 = smov 64   ;;  %s2116_s29 = smov 4  }
  0x1a   :  { %62 = dma.hbm_to_vmem [thread:$0]  %s2481_s6, 1024, %s57_s22, [#allocation5], %s2115_s4, %s2115_s4, %s2116_s29  }
  0x1b   :  { %s2117_s21 = smov [#allocation7]   ;;  %s2118_s23 = smov [#allocation10]  }
  0x1c   :  { %s88_s1 = sshll.u32 %s2117_s21, 4  ;;  %s114_s24 = sshll.u32 %s2118_s23, 4  ;;  %s89_s1 = int_to_ptr.vmem [resolvable:$true] %s88_s1  ;;  %s115_s24 = int_to_ptr.vmem [resolvable:$true] %s114_s24 }
  0x1d   :  { %s1974_s3 = scalar_lea.hbm %s2487_s12, 2048 }
  0x1e   :  { %p1975_p8 = scmp.ne.s32.totalorder %s2487_s12, %s1974_s3  ;;  %p1978_p9 = scmp.lt.u32.totalorder %s1974_s3, %s2487_s12 }
  0x20   :  { %p1980_p10 = pnand %p1978_p9, %p1975_p8 }
  0x22   :  { %1983 = shalt.err (!%p1980_p10)
}
  0x23   :  { %s1984_s6 = scalar_lea.vmem %s89_s1, 2048  ;;  %p1989_p12 = scmp.lt.s32.totalorder %s89_s1, %s89_s1 }
  0x24   :  { %p1985_p11 = scmp.ne.s32.totalorder %s89_s1, %s1984_s6  ;;  %p1990_p13 = scmp.lt.s32.totalorder %s1984_s6, %s1984_s6 }
  0x26   :  { %p1991_p0 = por %p1990_p13, %p1989_p12 }
  0x28   :  { %p1992_p1 = pnand %p1991_p0, %p1985_p11 }
  0x2a   :  { %1995 = shalt.err (!%p1992_p1)
}
  0x2b   :  { %94 = dma.hbm_to_vmem [thread:$0]  %s2487_s12, 2048, %s89_s1, [#allocation8], %s2115_s4, %s2115_s4, %s2116_s29  }
  0x2c   :  { %s1996_s21 = scalar_lea.hbm %s2491_s16, 1024 }
  0x2d   :  { %p1997_p2 = scmp.ne.s32.totalorder %s2491_s16, %s1996_s21  ;;  %p2000_p3 = scmp.lt.u32.totalorder %s1996_s21, %s2491_s16 }
  0x2f   :  { %p2002_p4 = pnand %p2000_p3, %p1997_p2 }
  0x31   :  { %2005 = shalt.err (!%p2002_p4)
}
  0x32   :  { %s2006_s26 = scalar_lea.vmem %s115_s24, 1024  ;;  %p2011_p6 = scmp.lt.s32.totalorder %s115_s24, %s115_s24 }
  0x33   :  { %p2007_p5 = scmp.ne.s32.totalorder %s115_s24, %s2006_s26  ;;  %p2012_p7 = scmp.lt.s32.totalorder %s2006_s26, %s2006_s26 }
  0x35   :  { %p2013_p8 = por %p2012_p7, %p2011_p6 }
  0x37   :  { %p2014_p9 = pnand %p2013_p8, %p2007_p5 }
  0x39   :  { %2017 = shalt.err (!%p2014_p9)
}
  0x3a   :  { %120 = dma.hbm_to_vmem [thread:$0]  %s2491_s16, 1024, %s115_s24, [#allocation11], %s2115_s4, %s2115_s4, %s2116_s29  }
  0x3b   :  { %s2119_s27 = smov [#allocation2]   ;;  %s2506_s30 = sld [smem:[#allocation21_spill]] }
  0x3c   :  { %s42_s28 = sshll.u32 %s2119_s27, 4  ;;  %s43_s28 = int_to_ptr.vmem [resolvable:$true] %s42_s28 }
  0x41   :  { %s2018_s0 = scalar_lea.hbm %s2506_s30, 3072 }
  0x42   :  { %p2019_p10 = scmp.ne.s32.totalorder %s2506_s30, %s2018_s0  ;;  %p2022_p11 = scmp.lt.u32.totalorder %s2018_s0, %s2506_s30 }
  0x44   :  { %p2024_p12 = pnand %p2022_p11, %p2019_p10 }
  0x46   :  { %2027 = shalt.err (!%p2024_p12)
}
  0x47   :  { %s2028_s25 = scalar_lea.vmem %s43_s28, 3072  ;;  %p2033_p0 = scmp.lt.s32.totalorder %s43_s28, %s43_s28 }
  0x48   :  { %p2029_p13 = scmp.ne.s32.totalorder %s43_s28, %s2028_s25  ;;  %p2034_p1 = scmp.lt.s32.totalorder %s2028_s25, %s2028_s25 }
  0x4a   :  { %p2035_p2 = por %p2034_p1, %p2033_p0 }
  0x4c   :  { %p2036_p3 = pnand %p2035_p2, %p2029_p13 }
  0x4e   :  { %2039 = shalt.err (!%p2036_p3)
}
  0x4f   :  { %s2120_s16 = smov 192   ;;  %s2121_s24 = smov 12  }
  0x50   :  { %48 = dma.hbm_to_vmem [thread:$0]  %s2506_s30, 3072, %s43_s28, [#allocation3], %s2120_s16, %s2120_s16, %s2121_s24  }
  0x51   :  { %s2122_s12 = smov [#allocation6]   ;;  %s2040_s22 = scalar_lea.hbm %s2485_s10, 2048 }
  0x52   :  { %s74_s1 = sshll.u32 %s2122_s12, 4  ;;  %p2041_p4 = scmp.ne.s32.totalorder %s2485_s10, %s2040_s22  ;;  %s75_s1 = int_to_ptr.vmem [resolvable:$true] %s74_s1 }
  0x53   :  { %p2044_p5 = scmp.lt.u32.totalorder %s2040_s22, %s2485_s10 }
  0x55   :  { %p2046_p6 = pnand %p2044_p5, %p2041_p4 }
  0x57   :  { %2049 = shalt.err (!%p2046_p6)
}
  0x58   :  { %s2050_s2 = scalar_lea.vmem %s75_s1, 2048  ;;  %p2055_p8 = scmp.lt.s32.totalorder %s75_s1, %s75_s1 }
  0x59   :  { %p2051_p7 = scmp.ne.s32.totalorder %s75_s1, %s2050_s2  ;;  %p2056_p9 = scmp.lt.s32.totalorder %s2050_s2, %s2050_s2 }
  0x5b   :  { %p2057_p10 = por %p2056_p9, %p2055_p8 }
  0x5d   :  { %p2058_p11 = pnand %p2057_p10, %p2051_p7 }
  0x5f   :  { %2061 = shalt.err (!%p2058_p11)
}
  0x60   :  { %s2123_s28 = smov 128   ;;  %s2124_s30 = smov 8  }
  0x61   :  { %80 = dma.hbm_to_vmem [thread:$0]  %s2485_s10, 2048, %s75_s1, [#allocation5], %s2123_s28, %s2123_s28, %s2124_s30  }
  0x62   :  { %s2125_s24 = smov [#allocation9]   ;;  %s2126_s26 = smov [#allocation12]  }
  0x63   :  { %s103_s3 = sshll.u32 %s2125_s24, 4  ;;  %s128_s12 = sshll.u32 %s2126_s26, 4  ;;  %s104_s3 = int_to_ptr.vmem [resolvable:$true] %s103_s3  ;;  %s129_s12 = int_to_ptr.vmem [resolvable:$true] %s128_s12 }
  0x64   :  { %s2062_s22 = scalar_lea.hbm %s2489_s14, 16 }
  0x65   :  { %p2063_p12 = scmp.ne.s32.totalorder %s2489_s14, %s2062_s22  ;;  %p2066_p13 = scmp.lt.u32.totalorder %s2062_s22, %s2489_s14 }
  0x67   :  { %p2068_p0 = pnand %p2066_p13, %p2063_p12 }
  0x69   :  { %2071 = shalt.err (!%p2068_p0)
}
  0x6a   :  { %s2072_s10 = scalar_lea.vmem %s104_s3, 16  ;;  %s2076_s1 = scalar_lea.vmem %s104_s3, 32 }
  0x6b   :  { %p2073_p1 = scmp.ne.s32.totalorder %s104_s3, %s2072_s10  ;;  %p2077_p2 = scmp.lt.s32.totalorder %s104_s3, %s104_s3 }
  0x6c   :  { %p2078_p3 = scmp.lt.s32.totalorder %s2076_s1, %s2072_s10 }
  0x6e   :  { %p2079_p4 = por %p2078_p3, %p2077_p2 }
  0x70   :  { %p2080_p5 = pnand %p2079_p4, %p2073_p1 }
  0x72   :  { %2083 = shalt.err (!%p2080_p5)
}
  0x73   :  { %106 = dma.hbm_to_vmem [thread:$0]  %s2489_s14, 16, %s104_s3, [#allocation8]  }
  0x74   :  { %s2084_s16 = scalar_lea.hbm %s2493_s18, 2048 }
  0x75   :  { %p2085_p6 = scmp.ne.s32.totalorder %s2493_s18, %s2084_s16  ;;  %p2088_p7 = scmp.lt.u32.totalorder %s2084_s16, %s2493_s18 }
  0x77   :  { %p2090_p8 = pnand %p2088_p7, %p2085_p6 }
  0x79   :  { %2093 = shalt.err (!%p2090_p8)
}
  0x7a   :  { %s2094_s22 = scalar_lea.vmem %s129_s12, 2048  ;;  %p2099_p10 = scmp.lt.s32.totalorder %s129_s12, %s129_s12 }
  0x7b   :  { %p2095_p9 = scmp.ne.s32.totalorder %s129_s12, %s2094_s22  ;;  %p2100_p11 = scmp.lt.s32.totalorder %s2094_s22, %s2094_s22 }
  0x7d   :  { %p2101_p12 = por %p2100_p11, %p2099_p10 }
  0x7f   :  { %p2102_p13 = pnand %p2101_p12, %p2095_p9 }
  0x81   :  { %2105 = shalt.err (!%p2102_p13)
}
  0x82   :  { %134 = dma.hbm_to_vmem [thread:$0]  %s2493_s18, 2048, %s129_s12, [#allocation11], %s2115_s4, %s2115_s4, %s2116_s29  }
  0x83   :  { %2106 = dma.done.wait [#allocation3], 3072  }
  0x84   :  { %2107 = vsyncadd [#allocation3], 4294964224 }
  0x85   :  { %2108 = dma.done.wait [#allocation5], 3072  }
  0x86   :  { %2109 = vsyncadd [#allocation5], 4294964224 }
  0x87   :  { %2110 = dma.done.wait [#allocation8], 2064  }
  0x88   :  { %2111 = vsyncadd [#allocation8], 4294965232 }
  0x89   :  { %2112 = dma.done.wait [#allocation11], 3072  }
  0x8a   :  { %2113 = vsyncadd [#allocation11], 4294964224  ;;  %v2127_v0 = vmov 0   ;;  %v2128_v1 = vmov 0.0   ;;  %s2507_s21 = sld [smem:[#allocation17_spill]]  ;;  %s2508_s29 = sld [smem:[#allocation19_spill]]  ;;  %v159_v25 = vlaneseq }
  0x8b   :  { %1827 = vset.pattern.permute.xlu0 %v2127_v0  ;;  %1709 = vmatprep.subr.bf16.mxu0 %v2128_v1  ;;  %vm2129_vm0 = vmmov 0   ;;  %v1836_v7 = vld [vmem:[#allocation2 + $0x4] ss:$12 sps:$4 sm:$0xff]   ;;  %v1838_v8 = vld [vmem:[#allocation2] ss:$12 sps:$4 sm:$0xff]   ;;  %v2131_v50 = vmov 0.0|0.0  }
  0x8c   :  { %491 = vmatprep.mubr.bf16.mxu1 %v2127_v0  ;;  %1725 = vmatprep.mubr.msk.bf16.mxu0 %vm2129_vm0, %v2128_v1  ;;  %v1840_v10 = vld [vmem:[#allocation2 + $0x1c] ss:$12 sps:$4 sm:$0xff]   ;;  %v1842_v11 = vld [vmem:[#allocation2 + $0x18] ss:$12 sps:$4 sm:$0xff]   ;;  %v1844_v12 = vld [vmem:[#allocation2 + $0x34] ss:$12 sps:$4 sm:$0xff]  }
  0x8d   :  { %459 = vmatprep.subr.bf16.mxu1 %v1836_v7  ;;  %v1846_v14 = vld [vmem:[#allocation2 + $0x30] ss:$12 sps:$4 sm:$0xff]   ;;  %v1848_v16 = vld [vmem:[#allocation2 + $0x4c] ss:$12 sps:$4 sm:$0xff]   ;;  %v1850_v17 = vld [vmem:[#allocation2 + $0x48] ss:$12 sps:$4 sm:$0xff]  }
  0x8e   :  { %460 = vmatpush1.bf16.msra.mxu1 %v1838_v8  ;;  %v1852_v19 = vld [vmem:[#allocation2 + $0x64] ss:$12 sps:$4 sm:$0xff]   ;;  %v1854_v20 = vld [vmem:[#allocation2 + $0x60] ss:$12 sps:$4 sm:$0xff]   ;;  %v1856_v22 = vld [vmem:[#allocation2 + $0x7c] ss:$12 sps:$4 sm:$0xff]  }
  0x8f   :  { %461 = vmatprep.subr.bf16.mxu1 %v1840_v10  ;;  %v1858_v23 = vld [vmem:[#allocation2 + $0x78] ss:$12 sps:$4 sm:$0xff]   ;;  %v1860_v24 = vld [vmem:[#allocation2 + $0x94] ss:$12 sps:$4 sm:$0xff]   ;;  %v160_v27 = vand.u32 127, %v159_v25  ;;  %v2398_v51 = vshrl.u32 %v159_v25, 7 }
  0x90   :  { %v161_v2 = vld [vmem:[%s2507_s21] sm:$0xff]  ;;  %v162_v4 = vld [vmem:[%s2507_s21 + $0x8] sm:$0xff]  ;;  %v1830_v6 = vld [vmem:[%s2508_s29 + $0x10] sm:$0xff]   ;;  %v2130_v30 = vmov 1.0|1.0   ;;  %s2509_s21 = sld [smem:[#allocation20_spill]] }
  0x91   :  { %164 = vperm.xlu0 %1827, %v161_v2   ;;  %v1828_v3 = vld [vmem:[%s2508_s29] sm:$0xff]   ;;  %v1829_v5 = vld [vmem:[%s2508_s29 + $0x8] sm:$0xff]   ;;  %v1831_v9 = vld [vmem:[%s2508_s29 + $0x18] sm:$0xff]   ;;  %v326_v52 = vsub.s32 2, %v2398_v51  ;;  %v322_v54 = vsub.s32 1, %v2398_v51  ;;  %v318_v7 = vsub.s32 0, %v2398_v51 }
  0x92   :  { %1710 = vmatpush3.bf16.msra.mxu0 %v1828_v3  ;;  %v1832_v13 = vld [vmem:[%s2508_s29 + $0x20] sm:$0xff]   ;;  %462 = vmatpush1.bf16.msra.mxu1 %v1842_v11  ;;  %v1833_v15 = vld [vmem:[%s2508_s29 + $0x28] sm:$0xff]   ;;  %v1834_v18 = vld [vmem:[%s2508_s29 + $0x30] sm:$0xff]   ;;  %s2510_s10 = sld [smem:[#allocation18_spill]]  ;;  %vm613_vm4 = vcmask 123904   ;;  %vm625_vm5 = vcmask 130048  }
  0x93   :  { %1711 = vmatprep.subr.bf16.mxu0 %v2128_v1  ;;  %463 = vmatprep.subr.bf16.mxu1 %v1844_v12  ;;  %v1835_v21 = vld [vmem:[%s2508_s29 + $0x38] sm:$0xff]   ;;  %v1839_v29 = vld [vmem:[#allocation2 + $0x8] ss:$12 sps:$4 sm:$0xff]   ;;  %v1843_v31 = vld [vmem:[#allocation2 + $0x20] ss:$12 sps:$4 sm:$0xff]   ;;  %vm814_vm6 = vcmask 1041408  }
  0x94   :  { %v1847_v32 = vld [vmem:[#allocation2 + $0x38] ss:$12 sps:$4 sm:$0xff]   ;;  %v1851_v33 = vld [vmem:[#allocation2 + $0x50] ss:$12 sps:$4 sm:$0xff]   ;;  %v1855_v34 = vld [vmem:[#allocation2 + $0x68] ss:$12 sps:$4 sm:$0xff]  }
  0x95   :  { %167 = vperm.xlu0 %1827, %v162_v4   ;;  %v1859_v35 = vld [vmem:[#allocation2 + $0x80] ss:$12 sps:$4 sm:$0xff]   ;;  %v1862_v36 = vld [vmem:[#allocation2 + $0x90] ss:$12 sps:$4 sm:$0xff]   ;;  %v1863_v37 = vld [vmem:[#allocation2 + $0x98] ss:$12 sps:$4 sm:$0xff]  }
  0x96   :  { %1712 = vmatpush3.bf16.msra.mxu0 %v1829_v5  ;;  %464 = vmatpush1.bf16.msra.mxu1 %v1846_v14  ;;  %v1864_v38 = vld [vmem:[#allocation2 + $0xac] ss:$12 sps:$4 sm:$0xff]   ;;  %v1866_v39 = vld [vmem:[#allocation2 + $0xa8] ss:$12 sps:$4 sm:$0xff]   ;;  %v1867_v40 = vld [vmem:[#allocation2 + $0xb0] ss:$12 sps:$4 sm:$0xff]  }
  0x97   :  { %1713 = vmatprep.subr.bf16.mxu0 %v2128_v1  ;;  %465 = vmatprep.subr.bf16.mxu1 %v1848_v16  ;;  %v190_v41 = vld [vmem:[%s2509_s21] sm:$0xff]  ;;  %v191_v43 = vld [vmem:[%s2509_s21 + $0x8] sm:$0xff]  ;;  %s2511_s14 = sld [smem:[#allocation22_spill]] }
  0x98   :  { %v314_v53 = vld [vmem:[%s2480_s5] sm:$0x7]  ;;  %v1869_v25 = vld [vmem:[#allocation4 + $0x8] sm:$0xff]  }
  0x99   :  { %v327_v55 = vrot.slane %v314_v53, %v326_v52  ;;  %v323_v58 = vrot.slane %v314_v53, %v322_v54  ;;  %v319_v10 = vrot.slane %v314_v53, %v318_v7  ;;  %v542_v12 = vld [vmem:[%s2510_s10] sm:$0x3] }
  0x9a   :  { %1714 = vmatpush3.bf16.msra.mxu0 %v1830_v6  ;;  %466 = vmatpush1.bf16.msra.mxu1 %v1850_v17 }
  0x9b   :  { %1715 = vmatprep.subr.bf16.mxu0 %v2128_v1  ;;  %467 = vmatprep.subr.bf16.mxu1 %v1852_v19 }
  0x9e   :  { %1716 = vmatpush3.bf16.msra.mxu0 %v1831_v9  ;;  %468 = vmatpush1.bf16.msra.mxu1 %v1854_v20 }
  0x9f   :  { %1717 = vmatprep.subr.bf16.mxu0 %v2128_v1  ;;  %469 = vmatprep.subr.bf16.mxu1 %v1856_v22 }
  0xa2   :  { %1718 = vmatpush3.bf16.msra.mxu0 %v1832_v13  ;;  %470 = vmatpush1.bf16.msra.mxu1 %v1858_v23  ;;  %v1868_v23 = vld [vmem:[#allocation4] sm:$0xff]  }
  0xa3   :  { %1719 = vmatprep.subr.bf16.mxu0 %v2128_v1  ;;  %471 = vmatprep.subr.bf16.mxu1 %v1860_v24 }
  0xa6   :  { %1720 = vmatpush3.bf16.msra.mxu0 %v1833_v15  ;;  %472 = vmatpush1.bf16.msra.mxu1 %v1862_v36 }
  0xa7   :  { %1721 = vmatprep.subr.bf16.mxu0 %v2128_v1  ;;  %473 = vmatprep.subr.bf16.mxu1 %v1864_v38 }
  0xaa   :  { %1722 = vmatpush3.bf16.msra.mxu0 %v1834_v18  ;;  %474 = vmatpush1.bf16.msra.mxu1 %v1866_v39 }
  0xab   :  { %1723 = vmatprep.subr.bf16.mxu0 %v2128_v1  ;;  %1806 = vmatprep.subr.bf16.mxu1 %v2131_v50 }
  0xae   :  { %1724 = vmatpush3.bf16.msra.mxu0 %v1835_v21 }
  0xaf   :  { %1729 = vmatprep.subr.bf16.mxu0 %v2128_v1 }
 0x110   :  { %v165_v26 = vpop.permute.xlu0 %164 }
 0x111   :  { %vm169_vm1 = vcmp.eq.s32.totalorder %v160_v27, %v165_v26  ;;  %v1870_v26 = vld [vmem:[#allocation4 + $0x10] sm:$0xff]  }
 0x114   :  { %v168_v28 = vpop.permute.xlu0 %167 }
 0x115   :  { %vm170_vm2 = vcmp.eq.s32.totalorder %v160_v27, %v168_v28  ;;  %v1871_v27 = vld [vmem:[#allocation4 + $0x18] sm:$0xff]   ;;  %v1872_v28 = vld [vmem:[#allocation4 + $0x20] sm:$0xff]  }
 0x116   :  { %vm1524_vm3 = vmpackc.low %vm170_vm2, %vm169_vm1 }
 0x117   :  { %1726 = vmatmul.mubr.msk.bf16.vlgmr.msra.gmra.mrb[0].mxu0 %vm1524_vm3, %v2130_v30  ;;  %v1874_v30 = vld [vmem:[#allocation4 + $0x30] sm:$0xff]  }
 0x118   :  { %1730 = vmatpush3.bf16.msra.mxu0 %v1839_v29  ;;  %1745 = vmatprep.mubr.msk.bf16.mxu0 %vm2129_vm0, %v2128_v1  ;;  %v1873_v29 = vld [vmem:[#allocation4 + $0x28] sm:$0xff]  }
 0x119   :  { %1731 = vmatprep.subr.bf16.mxu0 %v2128_v1 }
 0x11c   :  { %1732 = vmatpush3.bf16.msra.mxu0 %v1843_v31  ;;  %v1875_v31 = vld [vmem:[#allocation4 + $0x38] sm:$0xff]  }
 0x11d   :  { %1733 = vmatprep.subr.bf16.mxu0 %v2128_v1 }
 0x120   :  { %1734 = vmatpush3.bf16.msra.mxu0 %v1847_v32 }
 0x121   :  { %1735 = vmatprep.subr.bf16.mxu0 %v2128_v1 }
 0x124   :  { %1736 = vmatpush3.bf16.msra.mxu0 %v1851_v33 }
 0x125   :  { %1737 = vmatprep.subr.bf16.mxu0 %v2128_v1 }
 0x128   :  { %1738 = vmatpush3.bf16.msra.mxu0 %v1855_v34 }
 0x129   :  { %1739 = vmatprep.subr.bf16.mxu0 %v2128_v1 }
 0x12c   :  { %1740 = vmatpush3.bf16.msra.mxu0 %v1859_v35  ;;  %v1551_v35 = vld [vmem:[%s2482_s7] ss:$0 sm:$0xff] }
 0x12d   :  { %1741 = vmatprep.subr.bf16.mxu0 %v2128_v1 }
 0x130   :  { %1742 = vmatpush3.bf16.msra.mxu0 %v1863_v37 }
 0x131   :  { %1743 = vmatprep.subr.bf16.mxu0 %v2128_v1 }
 0x134   :  { %1744 = vmatpush3.bf16.msra.mxu0 %v1867_v40 }
 0x135   :  { %1803 = vmatprep.subr.bf16.mxu0 %v2131_v50 }
 0x1ea   :  { %v274_v42 = vpop.f32.mrb[0].mxu0 }
 0x1eb   :  { %v1727_v44 = vpop.f32.mrb[1].mxu0  ;;  %v2391_v46 = vadd.f32 %v274_v42, %v190_v41 }
 0x1ec   :  { %v277_v45 = vpop.f32.mrb[2].mxu0  ;;  %v1878_v44 = vld [vmem:[#allocation6 + $0x4] ss:$8 sps:$4 sm:$0xff]  }
 0x1ed   :  { %v278_v47 = vadd.f32 %v277_v45, %v191_v43  ;;  %v1728_v48 = vpop.f32.mrb[3].mxu0  ;;  %v1876_v43 = vld [vmem:[#allocation6] ss:$8 sps:$4 sm:$0xff]   ;;  %v1881_v45 = vld [vmem:[#allocation6 + $0x14] ss:$8 sps:$4 sm:$0xff]  }
 0x1ee   :  { %v1884_v48 = vld [vmem:[#allocation6 + $0x24] ss:$8 sps:$4 sm:$0xff]  }
 0x1ef   :  { %v313_v49 = vpack.c.bf16 %v278_v47, %v2391_v46  ;;  %v1879_v47 = vld [vmem:[#allocation6 + $0x10] ss:$8 sps:$4 sm:$0xff]  }
 0x1f1   :  { %492 = vmatmul.mubr.bf16.vlgmr.msra.gmra.mrb[0].mxu1 %v313_v49  ;;  %1746 = vmatmul.mubr.bf16.vlgmr.msra.gmra.mrb[4].mxu0 %v313_v49  ;;  %v1882_v49 = vld [vmem:[#allocation6 + $0x20] ss:$8 sps:$4 sm:$0xff]  }
 0x1f2   :  { %1753 = vmatprep.mubr.msk.f32.mxu0 %vm2129_vm0, %v2128_v1  ;;  %1760 = vmatprep.mubr.msk.f32.mxu1 %vm2129_vm0, %v2128_v1 }
 0x2c4   :  { %v493_v56 = vpop.f32.mrb[0].mxu1  ;;  %v535_v57 = vpop.f32.mrb[4].mxu0 }
 0x2c5   :  { %v536_v59 = vadd.f32 %v535_v57, %v327_v55  ;;  %v495_v60 = vpop.f32.mrb[1].mxu1  ;;  %v1747_v61 = vpop.f32.mrb[5].mxu0  ;;  %v494_v11 = vadd.f32 %v493_v56, %v319_v10  ;;  %v1887_v56 = vld [vmem:[#allocation6 + $0x34] ss:$8 sps:$4 sm:$0xff]   ;;  %v1885_v57 = vld [vmem:[#allocation6 + $0x30] ss:$8 sps:$4 sm:$0xff]  }
 0x2c6   :  { %v497_v62 = vpop.f32.mrb[2].mxu1  ;;  %v538_v63 = vpop.f32.mrb[6].mxu0  ;;  %v496_v5 = vadd.f32 %v495_v60, %v323_v58  ;;  %v1893_v60 = vld [vmem:[#allocation6 + $0x54] ss:$8 sps:$4 sm:$0xff]   ;;  %v1891_v61 = vld [vmem:[#allocation6 + $0x50] ss:$8 sps:$4 sm:$0xff]  }
 0x2c7   :  { %v539_v2 = vadd.f32 %v538_v63, %v327_v55  ;;  %v498_v3 = vpop.f32.mrb[3].mxu1  ;;  %v1748_v4 = vpop.f32.mrb[7].mxu0  ;;  %v1896_v62 = vld [vmem:[#allocation6 + $0x64] ss:$8 sps:$4 sm:$0xff]   ;;  %v1894_v63 = vld [vmem:[#allocation6 + $0x60] ss:$8 sps:$4 sm:$0xff]  }
 0x2c8   :  { %v499_v6 = vadd.f32 %v498_v3, %v323_v58  ;;  %v1890_v58 = vld [vmem:[#allocation6 + $0x44] ss:$8 sps:$4 sm:$0xff]   ;;  %v1897_v3 = vld [vmem:[#allocation6 + $0x70] ss:$8 sps:$4 sm:$0xff]  }
 0x2c9   :  { %v1807_v8 = vpack.c.bf16 %v539_v2, %v536_v59  ;;  %v1888_v59 = vld [vmem:[#allocation6 + $0x40] ss:$8 sps:$4 sm:$0xff]   ;;  %v1899_v2 = vld [vmem:[#allocation6 + $0x74] ss:$8 sps:$4 sm:$0xff]  }
 0x2ca   :  { %v1804_v9 = vpack.c.bf16 %v499_v6, %v496_v5 }
 0x2cb   :  { %1808 = vmatpush3.bf16.msra.mxu1 %v1807_v8 }
 0x2cc   :  { %1805 = vmatpush3.bf16.xpose.msra.mxu0 %v1804_v9  ;;  %1763 = vmatprep.subr.bf16.mxu1 %v2128_v1  ;;  %v1560_v9 = vld [vmem:[%s2483_s8] ss:$0 sm:$0xff] }
 0x2cd   :  { %952 = vmatprep.subr.bf16.mxu0 %v1878_v44 }
 0x2d3   :  { %1754 = vmatmul.mubr.f32.vlgmr.msra.gmra.mrb[8].mxu0 %v494_v11  ;;  %v1561_v11 = vld [vmem:[%s2484_s9] ss:$0 sm:$0xff] }
 0x2d4   :  { %984 = vmatprep.mubr.bf16.mxu0 %v2127_v0  ;;  %953 = vmatpush1.bf16.msra.mxu0 %v1876_v43 }
 0x2d5   :  { %954 = vmatprep.subr.bf16.mxu0 %v1881_v45 }
 0x2d8   :  { %955 = vmatpush1.bf16.msra.mxu0 %v1879_v47 }
 0x2d9   :  { %956 = vmatprep.subr.bf16.mxu0 %v1884_v48 }
 0x2dc   :  { %957 = vmatpush1.bf16.msra.mxu0 %v1882_v49 }
 0x2dd   :  { %958 = vmatprep.subr.bf16.mxu0 %v1887_v56 }
 0x2e0   :  { %959 = vmatpush1.bf16.msra.mxu0 %v1885_v57 }
 0x2e1   :  { %960 = vmatprep.subr.bf16.mxu0 %v1890_v58 }
 0x2e4   :  { %961 = vmatpush1.bf16.msra.mxu0 %v1888_v59  ;;  %v1578_v59 = vld [vmem:[%s2488_s13] ss:$0 sm:$0xff] }
 0x2e5   :  { %962 = vmatprep.subr.bf16.mxu0 %v1893_v60 }
 0x2e8   :  { %963 = vmatpush1.bf16.msra.mxu0 %v1891_v61 }
 0x2e9   :  { %964 = vmatprep.subr.bf16.mxu0 %v1896_v62 }
 0x2ec   :  { %965 = vmatpush1.bf16.msra.mxu0 %v1894_v63 }
 0x2ed   :  { %966 = vmatprep.subr.bf16.mxu0 %v1899_v2 }
 0x2f0   :  { %967 = vmatpush1.bf16.msra.mxu0 %v1897_v3 }
 0x2f1   :  { %1783 = vmatprep.subr.bf16.mxu0 %v2128_v1 }
 0x3a6   :  { %v609_v13 = vpop.f32.mrb[8].mxu0 }
 0x3a7   :  { %v610_v14 = vadd.f32 %v609_v13, %v542_v12  ;;  %v1755_v15 = vpop.f32.mrb[9].mxu0 }
 0x3a8   :  { %v1900_v15 = vld [vmem:[#allocation7 + $0x40] sm:$0xff]  }
 0x3a9   :  { %v614_v16 = vsel %vm613_vm4, %v610_v14, -inf }
 0x3aa   :  { %615 = vmax.xlane.f32.xlu1 %v614_v16  ;;  %v1901_v16 = vld [vmem:[#allocation7] sm:$0xff]  }
 0x437   :  { %v616_v17 = vpop.xlane.xlu1 %615 }
 0x438   :  { %v617_v18 = vsub.f32 %v610_v14, %v616_v17  ;;  %v1902_v17 = vld [vmem:[#allocation7 + $0x48] sm:$0xff]  }
 0x43a   :  { %v618_v19 = vmul.f32 1.442695, %v617_v18  ;;  %v1903_v18 = vld [vmem:[#allocation7 + $0x8] sm:$0xff]  }
 0x43c   :  { %1940 = vpow2.f32 %v618_v19  ;;  %v1904_v19 = vld [vmem:[#allocation7 + $0x50] sm:$0xff]  }
 0x446   :  { %v1941_v20 = vpop.eup %1940 }
 0x447   :  { %v620_v21 = vsel %vm613_vm4, %v1941_v20, 0.0 }
 0x448   :  { %621 = vadd.xlane.f32.xlu1 %v620_v21  ;;  %v1906_v21 = vld [vmem:[#allocation7 + $0x58] sm:$0xff]  }
 0x4d5   :  { %v622_v22 = vpop.xlane.xlu1 %621 }
 0x4d6   :  { %1942 = vrcp.f32 %v622_v22  ;;  %v1907_v22 = vld [vmem:[#allocation7 + $0x18] sm:$0xff]  }
 0x4e0   :  { %v1943_v0 = vpop.eup %1942 }
 0x4e1   :  { %v624_v24 = vmul.f32 %v1943_v0, %v1941_v20  ;;  %v1905_v20 = vld [vmem:[#allocation7 + $0x10] sm:$0xff]   ;;  %v1908_v0 = vld [vmem:[#allocation7 + $0x60] sm:$0xff]  }
 0x4e3   :  { %1761 = vmatmul.mubr.msk.f32.vlgmr.msra.gmra.mrb[4].mxu1 %vm625_vm5, %v624_v24  ;;  %v1910_v24 = vld [vmem:[#allocation7 + $0x68] sm:$0xff]  }
 0x4e4   :  { %1764 = vmatpush3.bf16.msra.mxu1 %v1868_v23  ;;  %1779 = vmatprep.mubr.msk.bf16.mxu1 %vm2129_vm0, %v2128_v1  ;;  %v1909_v23 = vld [vmem:[#allocation7 + $0x20] sm:$0xff]  }
 0x4e5   :  { %1765 = vmatprep.subr.bf16.mxu1 %v2128_v1 }
 0x4e8   :  { %1766 = vmatpush3.bf16.msra.mxu1 %v1869_v25  ;;  %v1911_v25 = vld [vmem:[#allocation7 + $0x28] sm:$0xff]  }
 0x4e9   :  { %1767 = vmatprep.subr.bf16.mxu1 %v2128_v1 }
 0x4ec   :  { %1768 = vmatpush3.bf16.msra.mxu1 %v1870_v26  ;;  %v1912_v26 = vld [vmem:[#allocation7 + $0x70] sm:$0xff]  }
 0x4ed   :  { %1769 = vmatprep.subr.bf16.mxu1 %v2128_v1 }
 0x4f0   :  { %1770 = vmatpush3.bf16.msra.mxu1 %v1871_v27  ;;  %v1913_v27 = vld [vmem:[#allocation7 + $0x30] sm:$0xff]  }
 0x4f1   :  { %1771 = vmatprep.subr.bf16.mxu1 %v2128_v1 }
 0x4f4   :  { %1772 = vmatpush3.bf16.msra.mxu1 %v1872_v28  ;;  %v1914_v28 = vld [vmem:[#allocation7 + $0x78] sm:$0xff]  }
 0x4f5   :  { %1773 = vmatprep.subr.bf16.mxu1 %v2128_v1 }
 0x4f8   :  { %1774 = vmatpush3.bf16.msra.mxu1 %v1873_v29  ;;  %v1915_v29 = vld [vmem:[#allocation7 + $0x38] sm:$0xff]  }
 0x4f9   :  { %1775 = vmatprep.subr.bf16.mxu1 %v2128_v1 }
 0x4fc   :  { %1776 = vmatpush3.bf16.msra.mxu1 %v1874_v30  ;;  %v860_v30 = vld [vmem:[%s2486_s11] sm:$0x3] }
 0x4fd   :  { %1777 = vmatprep.subr.bf16.mxu1 %v2128_v1 }
 0x500   :  { %1778 = vmatpush3.bf16.msra.mxu1 %v1875_v31  ;;  %v865_v31 = vrot.slane %v860_v30, %v318_v7 }
 0x501   :  { %1656 = vmatprep.subr.bf16.mxu1 %v1900_v15  ;;  %v1920_v15 = vld [vmem:[#allocation10 + $0x20] sm:$0xff]  }
 0x5b6   :  { %v695_v32 = vpop.f32.mrb[4].mxu1 }
 0x5b7   :  { %v715_v33 = vpack.c.bf16 %v695_v32, %v695_v32  ;;  %v1762_v34 = vpop.f32.mrb[5].mxu1  ;;  %v869_v32 = vrot.slane %v860_v30, %v322_v54 }
 0x5b9   :  { %1780 = vmatmul.mubr.bf16.vlgmr.msra.gmra.mrb[8].mxu1 %v715_v33 }
 0x5ba   :  { %1657 = vmatpush3.bf16.msra.mxu1 %v1901_v16  ;;  %v1921_v16 = vld [vmem:[#allocation10 + $0x28] sm:$0xff]  }
 0x5bb   :  { %1658 = vmatprep.subr.bf16.mxu1 %v1902_v17  ;;  %v1922_v17 = vld [vmem:[#allocation10 + $0x30] sm:$0xff]  }
 0x5be   :  { %1659 = vmatpush3.bf16.msra.mxu1 %v1903_v18  ;;  %v1923_v18 = vld [vmem:[#allocation10 + $0x38] sm:$0xff]  }
 0x5bf   :  { %1660 = vmatprep.subr.bf16.mxu1 %v1904_v19  ;;  %v1924_v19 = vld [vmem:[#allocation12 + $0x40] sm:$0xff]  }
 0x5c2   :  { %1661 = vmatpush3.bf16.msra.mxu1 %v1905_v20  ;;  %v1925_v20 = vld [vmem:[#allocation12] sm:$0xff]  }
 0x5c3   :  { %1662 = vmatprep.subr.bf16.mxu1 %v1906_v21  ;;  %v1926_v21 = vld [vmem:[#allocation12 + $0x48] sm:$0xff]  }
 0x5c6   :  { %1663 = vmatpush3.bf16.msra.mxu1 %v1907_v22  ;;  %v1927_v22 = vld [vmem:[#allocation12 + $0x8] sm:$0xff]  }
 0x5c7   :  { %1664 = vmatprep.subr.bf16.mxu1 %v1908_v0  ;;  %v1928_v0 = vld [vmem:[#allocation12 + $0x50] sm:$0xff]  }
 0x5ca   :  { %1665 = vmatpush3.bf16.msra.mxu1 %v1909_v23  ;;  %v1929_v23 = vld [vmem:[#allocation12 + $0x10] sm:$0xff]  }
 0x5cb   :  { %1666 = vmatprep.subr.bf16.mxu1 %v1910_v24  ;;  %v1930_v24 = vld [vmem:[#allocation12 + $0x58] sm:$0xff]  }
 0x5ce   :  { %1667 = vmatpush3.bf16.msra.mxu1 %v1911_v25  ;;  %v1931_v25 = vld [vmem:[#allocation12 + $0x18] sm:$0xff]  }
 0x5cf   :  { %1668 = vmatprep.subr.bf16.mxu1 %v1912_v26  ;;  %v1932_v26 = vld [vmem:[#allocation12 + $0x60] sm:$0xff]  }
 0x5d2   :  { %1669 = vmatpush3.bf16.msra.mxu1 %v1913_v27  ;;  %v1933_v27 = vld [vmem:[#allocation12 + $0x20] sm:$0xff]  }
 0x5d3   :  { %1670 = vmatprep.subr.bf16.mxu1 %v1914_v28  ;;  %v1935_v28 = vld [vmem:[#allocation12 + $0x28] sm:$0xff]  }
 0x5d6   :  { %1671 = vmatpush3.bf16.msra.mxu1 %v1915_v29 }
 0x5d7   :  { %1687 = vmatprep.subr.bf16.mxu1 %v1924_v19 }
 0x68c   :  { %v805_v36 = vpop.f32.mrb[8].mxu1 }
 0x68d   :  { %v806_v37 = vadd.f32 %v1551_v35, %v805_v36  ;;  %v1781_v38 = vpop.f32.mrb[9].mxu1 }
 0x68e   :  { %v808_v39 = vpop.f32.mrb[10].mxu1 }
 0x68f   :  { %v1782_v40 = vpop.f32.mrb[11].mxu1  ;;  %v811_v41 = vadd.f32 %v806_v37, %v2391_v46 }
 0x691   :  { %v815_v42 = vsel %vm814_vm6, %v811_v41, 0.0 }
 0x692   :  { %816 = vadd.xlane.f32.xlu0 %v815_v42 }
 0x71f   :  { %v817_v50 = vpop.xlane.xlu0 %816 }
 0x720   :  { %v819_v52 = vmul.f32 0.0078125, %v817_v50 }
 0x722   :  { %v820_v53 = vsub.f32 %v811_v41, %v819_v52 }
 0x724   :  { %v821_v55 = vmul.f32 %v820_v53, %v820_v53 }
 0x726   :  { %v822_v46 = vsel %vm814_vm6, %v821_v55, 0.0 }
 0x727   :  { %823 = vadd.xlane.f32.xlu1 %v822_v46 }
 0x7b4   :  { %v824_v4 = vpop.xlane.xlu1 %823 }
 0x7b5   :  { %v825_v5 = vmul.f32 0.0078125, %v824_v4 }
 0x7b7   :  { %v826_v6 = vadd.f32 1e-05, %v825_v5  ;;  %v1916_v5 = vld [vmem:[#allocation10] sm:$0xff]  }
 0x7b9   :  { %1944 = vrsqrt.f32 %v826_v6  ;;  %v1917_v6 = vld [vmem:[#allocation10 + $0x8] sm:$0xff]  }
 0x7c3   :  { %v1945_v8 = vpop.eup %1944 }
 0x7c4   :  { %v828_v10 = vmul.f32 %v1945_v8, %v820_v53 }
 0x7c6   :  { %v835_v12 = vmul.f32 %v1560_v9, %v828_v10 }
 0x7c8   :  { %v2437_v13 = vadd.f32 %v1561_v11, %v835_v12 }
 0x7ca   :  { %v859_v14 = vpack.c.bf16 %v2437_v13, %v2437_v13 }
 0x7cc   :  { %985 = vmatmul.mubr.bf16.vlgmr.msra.gmra.mrb[12].mxu0 %v859_v14  ;;  %v1918_v14 = vld [vmem:[#allocation10 + $0x10] sm:$0xff]  }
 0x7cd   :  { %1799 = vmatprep.mubr.msk.bf16.mxu0 %vm2129_vm0, %v2128_v1  ;;  %1784 = vmatpush3.bf16.msra.mxu0 %v1916_v5 }
 0x7ce   :  { %1785 = vmatprep.subr.bf16.mxu0 %v2128_v1 }
 0x7d1   :  { %1786 = vmatpush3.bf16.msra.mxu0 %v1917_v6 }
 0x7d2   :  { %1787 = vmatprep.subr.bf16.mxu0 %v2128_v1 }
 0x7d5   :  { %1788 = vmatpush3.bf16.msra.mxu0 %v1918_v14 }
 0x7d6   :  { %1789 = vmatprep.subr.bf16.mxu0 %v2128_v1 }
 0x89f   :  { %v986_v33 = vpop.f32.mrb[12].mxu0 }
 0x8a0   :  { %v987_v34 = vadd.f32 %v986_v33, %v865_v31  ;;  %v988_v35 = vpop.f32.mrb[13].mxu0  ;;  %v1595_v33 = vld [vmem:[#allocation9] ss:$0 sm:$0xff] }
 0x8a1   :  { %v989_v36 = vadd.f32 %v988_v35, %v869_v32  ;;  %v990_v37 = vpop.f32.mrb[14].mxu0  ;;  %v1596_v35 = vld [vmem:[%s2490_s15] ss:$0 sm:$0xff] }
 0x8a2   :  { %v993_v38 = vmul.f32 %v987_v34, %v987_v34  ;;  %v991_v39 = vpop.f32.mrb[15].mxu0 }
 0x8a3   :  { %v994_v40 = vmul.f32 %v989_v36, %v989_v36  ;;  %v1936_v39 = vld [vmem:[#allocation12 + $0x70] sm:$0xff]  }
 0x8a4   :  { %v995_v41 = vmul.f32 %v993_v38, %v987_v34 }
 0x8a5   :  { %v996_v42 = vmul.f32 %v994_v40, %v989_v36  ;;  %v1937_v40 = vld [vmem:[#allocation12 + $0x30] sm:$0xff]  }
 0x8a6   :  { %v997_v43 = vmul.f32 0.044715, %v995_v41  ;;  %v1938_v41 = vld [vmem:[#allocation12 + $0x78] sm:$0xff]  }
 0x8a7   :  { %v998_v44 = vmul.f32 0.044715, %v996_v42  ;;  %v1939_v42 = vld [vmem:[#allocation12 + $0x38] sm:$0xff]  }
 0x8a8   :  { %v999_v45 = vadd.f32 %v997_v43, %v987_v34  ;;  %v1597_v43 = vld [vmem:[%s2492_s17] ss:$0 sm:$0xff] }
 0x8a9   :  { %v1000_v47 = vadd.f32 %v998_v44, %v989_v36 }
 0x8aa   :  { %v1001_v48 = vmul.f32 0.7978846, %v999_v45 }
 0x8ab   :  { %v1002_v49 = vmul.f32 0.7978846, %v1000_v47 }
 0x8ac   :  { %1946 = vtanh.f32 %v1001_v48 }
 0x8ad   :  { %1948 = vtanh.f32 %v1002_v49 }
 0x8b6   :  { %v1947_v51 = vpop.eup %1946 }
 0x8b7   :  { %v1949_v54 = vpop.eup %1948  ;;  %v1005_v7 = vadd.f32 1.0, %v1947_v51 }
 0x8b8   :  { %v1006_v50 = vadd.f32 1.0, %v1949_v54 }
 0x8b9   :  { %v1007_v52 = vmul.f32 0.5, %v1005_v7 }
 0x8ba   :  { %v1008_v53 = vmul.f32 0.5, %v1006_v50  ;;  %v1606_v50 = vld [vmem:[%s2494_s19] ss:$0 sm:$0xff] }
 0x8bb   :  { %v1009_v55 = vmul.f32 %v1007_v52, %v987_v34 }
 0x8bc   :  { %v1010_v46 = vmul.f32 %v1008_v53, %v989_v36 }
 0x8bd   :  { %v1043_v57 = vpack.c.bf16 %v1009_v55, %v1009_v55 }
 0x8be   :  { %v1044_v56 = vpack.c.bf16 %v1010_v46, %v1010_v46 }
 0x8c0   :  { %1180 = vmatprep.mubr.bf16.mxu1 %v1044_v56 }
 0x8c1   :  { %1181 = vmatmul.mubr.bf16.vlgmr.msra.gmra.mrb[12].mxu1 %v1043_v57 }
 0x8c2   :  { %1688 = vmatpush3.bf16.msra.mxu1 %v1925_v20 }
 0x8c3   :  { %1689 = vmatprep.subr.bf16.mxu1 %v1926_v21 }
 0x8c6   :  { %1690 = vmatpush3.bf16.msra.mxu1 %v1927_v22 }
 0x8c7   :  { %1691 = vmatprep.subr.bf16.mxu1 %v1928_v0 }
 0x8ca   :  { %1692 = vmatpush3.bf16.msra.mxu1 %v1929_v23 }
 0x8cb   :  { %1693 = vmatprep.subr.bf16.mxu1 %v1930_v24 }
 0x8ce   :  { %1694 = vmatpush3.bf16.msra.mxu1 %v1931_v25 }
 0x8cf   :  { %1695 = vmatprep.subr.bf16.mxu1 %v1932_v26 }
 0x8d2   :  { %1696 = vmatpush3.bf16.msra.mxu1 %v1933_v27 }
 0x994   :  { %v1672_v58 = vpop.f32.mrb[12].mxu1 }
 0x995   :  { %v1673_v60 = vpop.f32.mrb[13].mxu1 }
 0x996   :  { %v1674_v61 = vadd.f32 %v1673_v60, %v1672_v58  ;;  %v1675_v62 = vpop.f32.mrb[14].mxu1 }
 0x997   :  { %v1676_v63 = vpop.f32.mrb[15].mxu1 }
 0x998   :  { %v1183_v2 = vadd.f32 %v1674_v61, %v1578_v59 }
 0x99a   :  { %v1188_v3 = vadd.f32 %v1183_v2, %v2437_v13  ;;  %v1919_v13 = vld [vmem:[#allocation10 + $0x18] sm:$0xff]  }
 0x99b   :  { %1790 = vmatpush3.bf16.msra.mxu0 %v1919_v13 }
 0x99c   :  { %v1191_v4 = vsel %vm814_vm6, %v1188_v3, 0.0  ;;  %1791 = vmatprep.subr.bf16.mxu0 %v2128_v1 }
 0x99d   :  { %1192 = vadd.xlane.f32.xlu1 %v1191_v4 }
 0x99f   :  { %1792 = vmatpush3.bf16.msra.mxu0 %v1920_v15 }
 0x9a0   :  { %1793 = vmatprep.subr.bf16.mxu0 %v2128_v1 }
 0x9a3   :  { %1794 = vmatpush3.bf16.msra.mxu0 %v1921_v16 }
 0x9a4   :  { %1795 = vmatprep.subr.bf16.mxu0 %v2128_v1 }
 0x9a7   :  { %1796 = vmatpush3.bf16.msra.mxu0 %v1922_v17 }
 0x9a8   :  { %1797 = vmatprep.subr.bf16.mxu0 %v2128_v1  ;;  %v1934_v1 = vld [vmem:[#allocation12 + $0x68] sm:$0xff]  }
 0x9a9   :  { %1697 = vmatprep.subr.bf16.mxu1 %v1934_v1 }
 0x9aa   :  { %1698 = vmatpush3.bf16.msra.mxu1 %v1935_v28 }
 0x9ab   :  { %1798 = vmatpush3.bf16.msra.mxu0 %v1923_v18  ;;  %1699 = vmatprep.subr.bf16.mxu1 %v1936_v39 }
 0x9ae   :  { %1700 = vmatpush3.bf16.msra.mxu1 %v1937_v40 }
 0x9af   :  { %1701 = vmatprep.subr.bf16.mxu1 %v1938_v41 }
 0x9b2   :  { %1702 = vmatpush3.bf16.msra.mxu1 %v1939_v42 }
 0xa2a   :  { %v1193_v8 = vpop.xlane.xlu1 %1192 }
 0xa2b   :  { %v1194_v9 = vmul.f32 0.0078125, %v1193_v8 }
 0xa2d   :  { %v1195_v10 = vsub.f32 %v1188_v3, %v1194_v9 }
 0xa2f   :  { %v1196_v11 = vmul.f32 %v1195_v10, %v1195_v10 }
 0xa31   :  { %v1197_v12 = vsel %vm814_vm6, %v1196_v11, 0.0 }
 0xa32   :  { %1198 = vadd.xlane.f32.xlu1 %v1197_v12 }
 0xabf   :  { %v1199_v29 = vpop.xlane.xlu1 %1198 }
 0xac0   :  { %v1200_v30 = vmul.f32 0.0078125, %v1199_v29 }
 0xac2   :  { %v1201_v31 = vadd.f32 1e-05, %v1200_v30 }
 0xac4   :  { %1950 = vrsqrt.f32 %v1201_v31 }
 0xace   :  { %v1951_v32 = vpop.eup %1950 }
 0xacf   :  { %v1203_v34 = vmul.f32 %v1951_v32, %v1195_v10 }
 0xad1   :  { %v1210_v36 = vmul.f32 %v1595_v33, %v1203_v34 }
 0xad3   :  { %v1217_v37 = vadd.f32 %v1596_v35, %v1210_v36 }
 0xad5   :  { %v1234_v38 = vpack.c.bf16 %v1217_v37, %v1217_v37 }
 0xad7   :  { %1800 = vmatmul.mubr.bf16.vlgmr.msra.gmra.mrb[16].mxu0 %v1234_v38 }
 0xbaa   :  { %v1324_v44 = vpop.f32.mrb[16].mxu0 }
 0xbab   :  { %v1325_v45 = vadd.f32 %v1597_v43, %v1324_v44  ;;  %v1801_v47 = vpop.f32.mrb[17].mxu0 }
 0xbac   :  { %v1327_v48 = vpop.f32.mrb[18].mxu0 }
 0xbad   :  { %v1330_v49 = vmax.f32 %v1325_v45, 0.0  ;;  %v1802_v51 = vpop.f32.mrb[19].mxu0 }
 0xbaf   :  { %v1363_v54 = vpack.c.bf16 %v1330_v49, %v1330_v49 }
 0xbb1   :  { %1499 = vmatprep.mubr.bf16.mxu1 %v1363_v54 }
 0xbb2   :  { %1500 = vmatmul.mubr.bf16.vlgmr.msra.gmra.mrb[16].mxu1 %v1234_v38 }
 0xc85   :  { %v1703_v7 = vpop.f32.mrb[16].mxu1 }
 0xc86   :  { %v1704_v52 = vpop.f32.mrb[17].mxu1 }
 0xc87   :  { %v1705_v53 = vadd.f32 %v1704_v52, %v1703_v7  ;;  %v1706_v55 = vpop.f32.mrb[18].mxu1 }
 0xc88   :  { %v1707_v46 = vpop.f32.mrb[19].mxu1 }
 0xc89   :  { %v1502_v56 = vadd.f32 %v1705_v53, %v1606_v50 }
 0xc8b   :  { %1507 = vst [vmem:[%s2511_s14] sm:$0x3] %v1502_v56 }
 0xc8c   :  { %1512 = vsyncpa [#allocation3], 1 }
 0xc8d   :  { %1513 = vsyncpa [#allocation5], 1 }
 0xc8e   :  { %1514 = vsyncpa [#allocation8], 1 }
 0xc8f   :  { %1515 = vsyncpa [#allocation11], 1 }

</bundles_post_ra>
